<compile_context>
chip_gen: v7x
topology: tpu7x:2x2x1
jax: 0.10.0
libtpu: 0.0.40
codegen_flags: <defaults>
</compile_context>

<pallas_src>
import jax
import jax.numpy as jnp
from jax.experimental import pallas as pl
from jax.experimental.pallas import tpu as pltpu


def se_gate_kernel(s_ref, w_ref, b_ref, x_ref, o_ref):
    # 1x1 conv on a 1x1 spatial input == matvec.  N=1, K=32 is <1% MXU
    # utilization, so compute it on the VPU/XLU: broadcast-multiply + reduce.
    #   s_ref: (1, C_in) f32   w_ref: (Cb, C_in) f32   b_ref: (Cb, 1) f32
    z = jnp.sum(w_ref[...] * s_ref[...], axis=1, keepdims=True) + b_ref[...]
    gate = jax.nn.sigmoid(z)                                # (Cb, 1), f32 (EUP)
    # Broadcast the gate along the spatial (lane) axis; channels on sublanes.
    # Multiply in f32, store in the feature-map dtype (bf16 path halves HBM).
    o_ref[...] = (x_ref[...].astype(jnp.float32) * gate).astype(o_ref.dtype)


def _num_channel_shards():
    # v7x has 2 TensorCores per chip with per-TC HBM paths -> split channels.
    # On v5e/v6e (single TC) the ~0.35us/step grid overhead isn't worth it.
    try:
        kind = jax.devices()[0].device_kind.lower()
    except Exception:  # pragma: no cover - defensive
        return 1
    return 2 if "v7" in kind else 1


def se_gate(x219, x216, weight, bias):
    """x219: [1, C_in, 1, 1] f32, x216: [1, C_out, H, W] (f32 or bf16),
    weight: [C_out, C_in, 1, 1] f32, bias: [C_out] f32 -> [1, C_out, H, W]
    in x216's dtype."""
    n, c_out, h, w = x216.shape
    c_in = x219.shape[1]
    hw = h * w

    num_shards = _num_channel_shards()
    if c_out % num_shards != 0 or (c_out // num_shards) % 8 != 0:
        num_shards = 1
    cb = c_out // num_shards

    s = x219.reshape(1, c_in).astype(jnp.float32)       # (1, 32)   gate input
    wmat = weight.reshape(c_out, c_in).astype(jnp.float32)  # (768, 32) native
    b = bias.reshape(c_out, 1).astype(jnp.float32)       # (768, 1)
    x = x216.reshape(c_out, hw)                          # (768, 196) free view

    itemsize = jnp.dtype(x216.dtype).itemsize
    cost = pl.CostEstimate(
        flops=2 * c_in * c_out + 2 * c_out * hw,
        transcendentals=c_out,
        bytes_accessed=2 * c_out * hw * itemsize
        + (c_in + c_out * c_in + c_out) * 4,
    )

    out = pl.pallas_call(
        se_gate_kernel,
        out_shape=jax.ShapeDtypeStruct((c_out, hw), x216.dtype),
        grid=(num_shards,),
        in_specs=[
            pl.BlockSpec((1, c_in), lambda i: (0, 0)),    # s   (shared)
            pl.BlockSpec((cb, c_in), lambda i: (i, 0)),   # W   (channel slice)
            pl.BlockSpec((cb, 1), lambda i: (i, 0)),      # b   (channel slice)
            pl.BlockSpec((cb, hw), lambda i: (i, 0)),     # x   (channel slice)
        ],
        out_specs=pl.BlockSpec((cb, hw), lambda i: (i, 0)),
        input_output_aliases={3: 0},                      # out reuses x buffer
        cost_estimate=cost,
        compiler_params=pltpu.CompilerParams(
            dimension_semantics=("parallel",)),
    )(s, wmat, b, x)

    return out.reshape(n, c_out, h, w)                    # free reshape back


# Donate x216 (arg index 1) so the in-kernel alias is honored without a copy.
se_gate_jit = jax.jit(se_gate, donate_argnums=(1,))


def reference(x219, x216, weight, bias):
    # pure-JAX f32 reference for correctness check
    c_out, c_in = weight.shape[0], weight.shape[1]
    z = (weight.reshape(c_out, c_in).astype(jnp.float32)
         @ x219.reshape(c_in, 1).astype(jnp.float32)
         + bias.reshape(c_out, 1).astype(jnp.float32))
    gate = jax.nn.sigmoid(z).reshape(1, c_out, 1, 1)
    return gate * x216.astype(jnp.float32)


if __name__ == "__main__":
    key = jax.random.PRNGKey(0)
    k1, k2, k3, k4 = jax.random.split(key, 4)

    C_IN, C_OUT, H, W = 32, 768, 14, 14

    x219 = jax.random.normal(k1, (1, C_IN, 1, 1), dtype=jnp.float32)
    x216 = jax.random.normal(k2, (1, C_OUT, H, W), dtype=jnp.float32)
    # deterministic conv parameters (Conv2d(32, 768, kernel_size=1) shapes)
    weight = jax.random.normal(k3, (C_OUT, C_IN, 1, 1), dtype=jnp.float32) / jnp.sqrt(C_IN)
    bias = jax.random.normal(k4, (C_OUT,), dtype=jnp.float32) * 0.01

    # References / casts first: the jitted call donates (invalidates) x216.
    ref = reference(x219, x216, weight, bias)
    jax.block_until_ready(ref)
    x216_bf16 = x216.astype(jnp.bfloat16)

    # f32 path: matches the PyTorch module semantics exactly.
    out = se_gate_jit(x219, x216, weight, bias)
    jax.block_until_ready(out)
    assert out.shape == (1, C_OUT, H, W), out.shape
    assert out.dtype == jnp.float32, out.dtype
    assert jnp.allclose(out, ref, atol=1e-5, rtol=1e-5), float(
        jnp.max(jnp.abs(out - ref)))

    # bf16 feature-map path (the recommended low-HBM-traffic configuration).
    out_bf16 = se_gate_jit(x219, x216_bf16, weight, bias)
    jax.block_until_ready(out_bf16)
    assert out_bf16.dtype == jnp.bfloat16, out_bf16.dtype
    assert jnp.allclose(out_bf16.astype(jnp.float32), ref, atol=3e-2, rtol=3e-2), float(
        jnp.max(jnp.abs(out_bf16.astype(jnp.float32) - ref)))

    print("KERNEL_OK")
</pallas_src>

<mosaic_0001>
module attributes {stable_mosaic.version = 11 : i64} {
  func.func @se_gate_kernel(%arg0: i32, %arg1: memref<1x32xf32, #tpu.memory_space<vmem>>, %arg2: memref<768x32xf32, #tpu.memory_space<vmem>>, %arg3: memref<768x1xf32, #tpu.memory_space<vmem>>, %arg4: memref<768x196xf32, #tpu.memory_space<vmem>>, %arg5: memref<768x196xf32, #tpu.memory_space<vmem>>) attributes {dimension_semantics = [#tpu.dimension_semantics<parallel>], iteration_bounds = array<i64: 1>, scalar_prefetch = 0 : i64, scratch_operands = 0 : i64, tpu.core_type = #tpu.core_type<tc>, window_params = [{pipeline_mode = #tpu.pipeline_mode<synchronous>, transform_indices = @transform_0, window_bounds = array<i64: 1, 32>}, {transform_indices = @transform_1, window_bounds = array<i64: 768, 32>}, {transform_indices = @transform_2, window_bounds = array<i64: 768, 1>}, {transform_indices = @transform_3, window_bounds = array<i64: 768, 196>}, {transform_indices = @transform_4, window_bounds = array<i64: 768, 196>}]} {
    %c0 = arith.constant 0 : index
    %c0_0 = arith.constant 0 : index
    %0 = vector.load %arg2[%c0, %c0_0] : memref<768x32xf32, #tpu.memory_space<vmem>>, vector<768x32xf32>
    %c0_1 = arith.constant 0 : index
    %c0_2 = arith.constant 0 : index
    %1 = vector.load %arg1[%c0_1, %c0_2] : memref<1x32xf32, #tpu.memory_space<vmem>>, vector<1x32xf32>
    %2 = vector.broadcast %1 : vector<1x32xf32> to vector<768x32xf32>
    %3 = arith.mulf %0, %2 : vector<768x32xf32>
    %cst = arith.constant dense<0.000000e+00> : vector<768xf32>
    %4 = vector.multi_reduction <add>, %3, %cst [1] : vector<768x32xf32> to vector<768xf32>
    %5 = vector.shape_cast %4 : vector<768xf32> to vector<768x1xf32>
    %c0_3 = arith.constant 0 : index
    %c0_4 = arith.constant 0 : index
    %6 = vector.load %arg3[%c0_3, %c0_4] : memref<768x1xf32, #tpu.memory_space<vmem>>, vector<768x1xf32>
    %7 = arith.addf %5, %6 : vector<768x1xf32>
    %8 = arith.negf %7 : vector<768x1xf32>
    %9 = math.exp %8 : vector<768x1xf32>
    %cst_5 = arith.constant 1.000000e+00 : f32
    %10 = vector.broadcast %cst_5 : f32 to vector<768x1xf32>
    %11 = arith.addf %10, %9 : vector<768x1xf32>
    %12 = arith.divf %10, %11 : vector<768x1xf32>
    %c0_6 = arith.constant 0 : index
    %c0_7 = arith.constant 0 : index
    %13 = vector.load %arg4[%c0_6, %c0_7] : memref<768x196xf32, #tpu.memory_space<vmem>>, vector<768x196xf32>
    %14 = vector.broadcast %12 : vector<768x1xf32> to vector<768x196xf32>
    %15 = arith.mulf %13, %14 : vector<768x196xf32>
    %c0_8 = arith.constant 0 : index
    %c0_9 = arith.constant 0 : index
    %16 = vector.load %arg5[%c0_8, %c0_9] : memref<768x196xf32, #tpu.memory_space<vmem>>, vector<768x196xf32>
    tpu.vector_store %arg5[%c0_8, %c0_9], %15 {strides = array<i32>} : memref<768x196xf32, #tpu.memory_space<vmem>>, vector<768x196xf32>,
    return
  }
  func.func @transform_0(%arg0: i32) -> (i32, i32) {
    %c0_i32 = arith.constant 0 : i32
    %c0_i32_0 = arith.constant 0 : i32
    %c0_i32_1 = arith.constant 0 : i32
    return %c0_i32, %c0_i32_0 : i32, i32
  }
  func.func @transform_1(%arg0: i32) -> (i32, i32) {
    %c0_i32 = arith.constant 0 : i32
    %c0_i32_0 = arith.constant 0 : i32
    return %arg0, %c0_i32 : i32, i32
  }
  func.func @transform_2(%arg0: i32) -> (i32, i32) {
    %c0_i32 = arith.constant 0 : i32
    %c0_i32_0 = arith.constant 0 : i32
    return %arg0, %c0_i32 : i32, i32
  }
  func.func @transform_3(%arg0: i32) -> (i32, i32) {
    %c0_i32 = arith.constant 0 : i32
    %c0_i32_0 = arith.constant 0 : i32
    return %arg0, %c0_i32 : i32, i32
  }
  func.func @transform_4(%arg0: i32) -> (i32, i32) {
    %c0_i32 = arith.constant 0 : i32
    %c0_i32_0 = arith.constant 0 : i32
    return %arg0, %c0_i32 : i32, i32
  }
}

</mosaic_0001>

<bundles_post_ra>
// kernel: se_gate.1
= control target key start
LH: loop header
LB: loop body
LE: loop exit
PB: predicated region body
PF: predicated region fallthrough
CT: control target
= control target key end

     0   :  { %vm216_vm0 = vcmask 261120   ;;  %vm2138_vm1 = vcmask 556032   ;;  %s5381_s0 = inlined_call_operand.vmem [shape: f32[1,32], index: 0, kind: input, shape index: {}]   ;;  %s5382_s1 = inlined_call_operand.vmem [shape: f32[768,32], index: 1, kind: input, shape index: {}]   ;;  %s5383_s2 = inlined_call_operand.vmem [shape: f32[768,1], index: 2, kind: input, shape index: {}]   ;;  %s5384_s3 = inlined_call_operand.vmem [shape: f32[768,196], index: 3, kind: input, shape index: {}, may-alias: {3,4}]   ;;  %s5385_s4 = inlined_call_operand.vmem [shape: f32[768,196], index: 4, kind: output, shape index: {}, may-alias: {3,4}]  }
   0x1   :  { %v19_v0 = vld [vmem:[%s5382_s1 + $0x10] sm:$0xff]  ;;  %v2850_v1 = vld [vmem:[%s5381_s0] ss:$0 sm:$0xff]  ;;  %v20_v5 = vld [vmem:[%s5382_s1 + $0x18] sm:$0xff] }
   0x2   :  { %v17_v2 = vld [vmem:[%s5382_s1] sm:$0xff]  ;;  %v122_v3 = vmul.f32 %v2850_v1, %v19_v0  ;;  %v18_v6 = vld [vmem:[%s5382_s1 + $0x8] sm:$0xff]  ;;  %v123_v8 = vmul.f32 %v2850_v1, %v20_v5  ;;  %v24_v14 = vld [vmem:[%s5382_s1 + $0x38] sm:$0xff] }
   0x3   :  { %v120_v4 = vmul.f32 %v2850_v1, %v17_v2  ;;  %v22_v7 = vld [vmem:[%s5382_s1 + $0x28] sm:$0xff]  ;;  %v121_v9 = vmul.f32 %v2850_v1, %v18_v6  ;;  %v21_v10 = vld [vmem:[%s5382_s1 + $0x20] sm:$0xff]  ;;  %v23_v18 = vld [vmem:[%s5382_s1 + $0x30] sm:$0xff]  ;;  %v127_v22 = vmul.f32 %v2850_v1, %v24_v14 }
   0x4   :  { %v223_v11 = vsel %vm216_vm0, %v122_v3, 0.0  ;;  %v125_v13 = vmul.f32 %v2850_v1, %v22_v7  ;;  %v226_v15 = vsel %vm216_vm0, %v123_v8, 0.0  ;;  %v124_v17 = vmul.f32 %v2850_v1, %v21_v10  ;;  %v26_v19 = vld [vmem:[%s5382_s1 + $0x48] sm:$0xff]  ;;  %v25_v20 = vld [vmem:[%s5382_s1 + $0x40] sm:$0xff]  ;;  %v28_v21 = vld [vmem:[%s5382_s1 + $0x58] sm:$0xff] }
   0x5   :  { %v217_v12 = vsel %vm216_vm0, %v120_v4, 0.0  ;;  %224 = vadd.xlane.f32.xlu1 %v223_v11  ;;  %v220_v16 = vsel %vm216_vm0, %v121_v9, 0.0  ;;  %v27_v23 = vld [vmem:[%s5382_s1 + $0x50] sm:$0xff]  ;;  %v30_v24 = vld [vmem:[%s5382_s1 + $0x68] sm:$0xff]  ;;  %v29_v25 = vld [vmem:[%s5382_s1 + $0x60] sm:$0xff]  ;;  %v126_v27 = vmul.f32 %v2850_v1, %v23_v18  ;;  %v129_v32 = vmul.f32 %v2850_v1, %v26_v19 }
   0x6   :  { %218 = vadd.xlane.f32.xlu0 %v217_v12  ;;  %v232_v26 = vsel %vm216_vm0, %v125_v13, 0.0  ;;  %v32_v28 = vld [vmem:[%s5382_s1 + $0x78] sm:$0xff]  ;;  %v31_v29 = vld [vmem:[%s5382_s1 + $0x70] sm:$0xff]  ;;  %v34_v30 = vld [vmem:[%s5382_s1 + $0x88] sm:$0xff]  ;;  %v229_v31 = vsel %vm216_vm0, %v124_v17, 0.0  ;;  %v128_v33 = vmul.f32 %v2850_v1, %v25_v20  ;;  %v131_v34 = vmul.f32 %v2850_v1, %v28_v21 }
   0x7   :  { %v33_v35 = vld [vmem:[%s5382_s1 + $0x80] sm:$0xff]  ;;  %v36_v36 = vld [vmem:[%s5382_s1 + $0x98] sm:$0xff]  ;;  %v35_v37 = vld [vmem:[%s5382_s1 + $0x90] sm:$0xff]  ;;  %v130_v38 = vmul.f32 %v2850_v1, %v27_v23  ;;  %v133_v39 = vmul.f32 %v2850_v1, %v30_v24  ;;  %v132_v40 = vmul.f32 %v2850_v1, %v29_v25  ;;  %v238_v42 = vsel %vm216_vm0, %v127_v22, 0.0 }
   0x8   :  { %v38_v41 = vld [vmem:[%s5382_s1 + $0xa8] sm:$0xff]  ;;  %v135_v43 = vmul.f32 %v2850_v1, %v32_v28  ;;  %v134_v44 = vmul.f32 %v2850_v1, %v31_v29  ;;  %v137_v45 = vmul.f32 %v2850_v1, %v34_v30  ;;  %v37_v46 = vld [vmem:[%s5382_s1 + $0xa0] sm:$0xff]  ;;  %v235_v47 = vsel %vm216_vm0, %v126_v27, 0.0  ;;  %v40_v55 = vld [vmem:[%s5382_s1 + $0xb8] sm:$0xff] }
   0x9   :  { %227 = vadd.xlane.f32.xlu1 %v226_v15  ;;  %v136_v48 = vmul.f32 %v2850_v1, %v33_v35  ;;  %v139_v49 = vmul.f32 %v2850_v1, %v36_v36  ;;  %v138_v50 = vmul.f32 %v2850_v1, %v35_v37  ;;  %v244_v51 = vsel %vm216_vm0, %v129_v32, 0.0  ;;  %v39_v60 = vld [vmem:[%s5382_s1 + $0xb0] sm:$0xff]  ;;  %v50_v61 = vld [vmem:[%s5382_s1 + $0x108] sm:$0xff]  ;;  %v49_v62 = vld [vmem:[%s5382_s1 + $0x100] sm:$0xff] }
   0xa   :  { %221 = vadd.xlane.f32.xlu0 %v220_v16  ;;  %v241_v52 = vsel %vm216_vm0, %v128_v33, 0.0  ;;  %v2946_v53 = vsel %vm216_vm0, %v131_v34, 0.0  ;;  %v141_v54 = vmul.f32 %v2850_v1, %v38_v41  ;;  %v2953_v56 = vsel %vm216_vm0, %v130_v38, 0.0  ;;  %v52_v3 = vld [vmem:[%s5382_s1 + $0x118] sm:$0xff]  ;;  %v51_v4 = vld [vmem:[%s5382_s1 + $0x110] sm:$0xff]  ;;  %v54_v5 = vld [vmem:[%s5382_s1 + $0x128] sm:$0xff] }
   0xb   :  { %v2956_v57 = vsel %vm216_vm0, %v133_v39, 0.0  ;;  %v2959_v58 = vsel %vm216_vm0, %v132_v40, 0.0  ;;  %v140_v59 = vmul.f32 %v2850_v1, %v37_v46  ;;  %v2972_v63 = vsel %vm216_vm0, %v135_v43, 0.0  ;;  %v53_v10 = vld [vmem:[%s5382_s1 + $0x120] sm:$0xff]  ;;  %v56_v11 = vld [vmem:[%s5382_s1 + $0x138] sm:$0xff]  ;;  %v55_v16 = vld [vmem:[%s5382_s1 + $0x130] sm:$0xff] }
   0xc   :  { %v2975_v0 = vsel %vm216_vm0, %v134_v44, 0.0  ;;  %v2978_v2 = vsel %vm216_vm0, %v137_v45, 0.0  ;;  %v2990_v6 = vsel %vm216_vm0, %v136_v48, 0.0  ;;  %v2993_v7 = vsel %vm216_vm0, %v139_v49, 0.0  ;;  %v58_v21 = vld [vmem:[%s5382_s1 + $0x148] sm:$0xff]  ;;  %v57_v22 = vld [vmem:[%s5382_s1 + $0x140] sm:$0xff] }
   0xd   :  { %233 = vadd.xlane.f32.xlu1 %v232_v26  ;;  %v2996_v8 = vsel %vm216_vm0, %v138_v50, 0.0  ;;  %v2999_v9 = vmul.f32 %v2850_v1, %v40_v55  ;;  %v3008_v12 = vsel %vm216_vm0, %v141_v54, 0.0  ;;  %v3011_v13 = vmul.f32 %v2850_v1, %v39_v60  ;;  %v60_v27 = vld [vmem:[%s5382_s1 + $0x158] sm:$0xff]  ;;  %v59_v28 = vld [vmem:[%s5382_s1 + $0x150] sm:$0xff]  ;;  %v62_v29 = vld [vmem:[%s5382_s1 + $0x168] sm:$0xff] }
   0xe   :  { %230 = vadd.xlane.f32.xlu0 %v229_v31  ;;  %v153_v14 = vmul.f32 %v2850_v1, %v50_v61  ;;  %v152_v15 = vmul.f32 %v2850_v1, %v49_v62  ;;  %v3019_v17 = vsel %vm216_vm0, %v140_v59, 0.0  ;;  %v155_v18 = vmul.f32 %v2850_v1, %v52_v3  ;;  %v61_v34 = vld [vmem:[%s5382_s1 + $0x160] sm:$0xff]  ;;  %v64_v35 = vld [vmem:[%s5382_s1 + $0x178] sm:$0xff]  ;;  %v63_v40 = vld [vmem:[%s5382_s1 + $0x170] sm:$0xff] }
   0xf   :  { %v154_v19 = vmul.f32 %v2850_v1, %v51_v4  ;;  %v157_v20 = vmul.f32 %v2850_v1, %v54_v5  ;;  %v156_v25 = vmul.f32 %v2850_v1, %v53_v10  ;;  %v159_v26 = vmul.f32 %v2850_v1, %v56_v11  ;;  %v66_v45 = vld [vmem:[%s5382_s1 + $0x188] sm:$0xff]  ;;  %v65_v46 = vld [vmem:[%s5382_s1 + $0x180] sm:$0xff]  ;;  %v71_v10 = vld [vmem:[%s5382_s1 + $0x1b0] sm:$0xff] }
  0x10   :  { %v3031_v23 = vsel %vm216_vm0, %v153_v14, 0.0  ;;  %v3034_v24 = vsel %vm216_vm0, %v152_v15, 0.0  ;;  %v3048_v30 = vsel %vm216_vm0, %v155_v18, 0.0  ;;  %v158_v33 = vmul.f32 %v2850_v1, %v55_v16  ;;  %v70_v54 = vld [vmem:[%s5382_s1 + $0x1a8] sm:$0xff]  ;;  %v69_v62 = vld [vmem:[%s5382_s1 + $0x1a0] sm:$0xff] }
  0x11   :  { %239 = vadd.xlane.f32.xlu1 %v238_v42  ;;  %v3051_v31 = vsel %vm216_vm0, %v154_v19, 0.0  ;;  %v3054_v32 = vsel %vm216_vm0, %v157_v20, 0.0  ;;  %v3064_v36 = vsel %vm216_vm0, %v156_v25, 0.0  ;;  %v3067_v37 = vsel %vm216_vm0, %v159_v26, 0.0  ;;  %v74_v18 = vld [vmem:[%s5382_s1 + $0x1c8] sm:$0xff]  ;;  %v73_v19 = vld [vmem:[%s5382_s1 + $0x1c0] sm:$0xff] }
  0x12   :  { %236 = vadd.xlane.f32.xlu0 %v235_v47  ;;  %v161_v38 = vmul.f32 %v2850_v1, %v58_v21  ;;  %v160_v39 = vmul.f32 %v2850_v1, %v57_v22  ;;  %v3075_v41 = vsel %vm216_vm0, %v158_v33, 0.0  ;;  %v163_v42 = vmul.f32 %v2850_v1, %v60_v27  ;;  %v76_v26 = vld [vmem:[%s5382_s1 + $0x1d8] sm:$0xff]  ;;  %v75_v27 = vld [vmem:[%s5382_s1 + $0x1d0] sm:$0xff] }
  0x13   :  { %v162_v43 = vmul.f32 %v2850_v1, %v59_v28  ;;  %v165_v44 = vmul.f32 %v2850_v1, %v62_v29  ;;  %v164_v49 = vmul.f32 %v2850_v1, %v61_v34  ;;  %v167_v50 = vmul.f32 %v2850_v1, %v64_v35  ;;  %v78_v28 = vld [vmem:[%s5382_s1 + $0x1e8] sm:$0xff] }
  0x14   :  { %v3087_v47 = vsel %vm216_vm0, %v161_v38, 0.0  ;;  %v3090_v48 = vsel %vm216_vm0, %v160_v39, 0.0  ;;  %v3106_v55 = vsel %vm216_vm0, %v163_v42, 0.0  ;;  %v166_v61 = vmul.f32 %v2850_v1, %v63_v40  ;;  %v77_v38 = vld [vmem:[%s5382_s1 + $0x1e0] sm:$0xff] }
  0x15   :  { %245 = vadd.xlane.f32.xlu1 %v244_v51  ;;  %v68_v51 = vld [vmem:[%s5382_s1 + $0x198] sm:$0xff]  ;;  %v3109_v59 = vsel %vm216_vm0, %v162_v43, 0.0  ;;  %v3112_v60 = vsel %vm216_vm0, %v165_v44, 0.0  ;;  %v3125_v3 = vsel %vm216_vm0, %v167_v50, 0.0  ;;  %v169_v4 = vmul.f32 %v2850_v1, %v66_v45  ;;  %v79_v43 = vld [vmem:[%s5382_s1 + $0x1f0] sm:$0xff]  ;;  %v82_v50 = vld [vmem:[%s5382_s1 + $0x208] sm:$0xff] }
  0x16   :  { %242 = vadd.xlane.f32.xlu0 %v241_v52  ;;  %v67_v52 = vld [vmem:[%s5382_s1 + $0x190] sm:$0xff]  ;;  %v168_v5 = vmul.f32 %v2850_v1, %v65_v46  ;;  %v3133_v11 = vsel %vm216_vm0, %v166_v61, 0.0  ;;  %v171_v14 = vmul.f32 %v2850_v1, %v68_v51  ;;  %v173_v16 = vmul.f32 %v2850_v1, %v70_v54  ;;  %v81_v51 = vld [vmem:[%s5382_s1 + $0x200] sm:$0xff] }
  0x17   :  { %v170_v15 = vmul.f32 %v2850_v1, %v67_v52  ;;  %v3145_v20 = vsel %vm216_vm0, %v169_v4, 0.0  ;;  %v172_v22 = vmul.f32 %v2850_v1, %v69_v62  ;;  %v174_v35 = vmul.f32 %v2850_v1, %v71_v10  ;;  %v83_v4 = vld [vmem:[%s5382_s1 + $0x210] sm:$0xff] }
  0x18   :  { %v3148_v21 = vsel %vm216_vm0, %v168_v5, 0.0  ;;  %v3164_v29 = vsel %vm216_vm0, %v171_v14, 0.0  ;;  %v3170_v34 = vsel %vm216_vm0, %v173_v16, 0.0  ;;  %v177_v40 = vmul.f32 %v2850_v1, %v74_v18  ;;  %v86_v5 = vld [vmem:[%s5382_s1 + $0x228] sm:$0xff]  ;;  %v85_v18 = vld [vmem:[%s5382_s1 + $0x220] sm:$0xff] }
  0x19   :  { %251 = vadd.xlane.f32.xlu1 %v2946_v53  ;;  %v72_v53 = vld [vmem:[%s5382_s1 + $0x1b8] sm:$0xff]  ;;  %v3167_v33 = vsel %vm216_vm0, %v170_v15, 0.0  ;;  %v176_v42 = vmul.f32 %v2850_v1, %v73_v19  ;;  %v3191_v44 = vsel %vm216_vm0, %v174_v35, 0.0  ;;  %v179_v45 = vmul.f32 %v2850_v1, %v76_v26  ;;  %v87_v26 = vld [vmem:[%s5382_s1 + $0x230] sm:$0xff] }
  0x1a   :  { %248 = vadd.xlane.f32.xlu0 %v2953_v56  ;;  %v3122_v56 = vsel %vm216_vm0, %v164_v49, 0.0  ;;  %v175_v25 = vmul.f32 %v2850_v1, %v72_v53  ;;  %v178_v46 = vmul.f32 %v2850_v1, %v75_v27  ;;  %v181_v49 = vmul.f32 %v2850_v1, %v78_v28  ;;  %v84_v53 = vld [vmem:[%s5382_s1 + $0x218] sm:$0xff] }
  0x1b   :  { %v3203_v52 = vsel %vm216_vm0, %v177_v40, 0.0  ;;  %v3206_v54 = vsel %vm216_vm0, %v176_v42, 0.0  ;;  %v180_v61 = vmul.f32 %v2850_v1, %v77_v38  ;;  %v3222_v10 = vsel %vm216_vm0, %v179_v45, 0.0  ;;  %v89_v40 = vld [vmem:[%s5382_s1 + $0x240] sm:$0xff] }
  0x1c   :  { %v3183_v39 = vsel %vm216_vm0, %v175_v25, 0.0  ;;  %v3225_v14 = vsel %vm216_vm0, %v178_v46, 0.0  ;;  %v3228_v15 = vsel %vm216_vm0, %v181_v49, 0.0  ;;  %v182_v16 = vmul.f32 %v2850_v1, %v79_v43  ;;  %v92_v49 = vld [vmem:[%s5382_s1 + $0x258] sm:$0xff] }
  0x1d   :  { %257 = vadd.xlane.f32.xlu1 %v2956_v57  ;;  %v80_v57 = vld [vmem:[%s5382_s1 + $0x1f8] sm:$0xff]  ;;  %v184_v25 = vmul.f32 %v2850_v1, %v81_v51  ;;  %v187_v28 = vmul.f32 %v2850_v1, %v84_v53  ;;  %v186_v35 = vmul.f32 %v2850_v1, %v83_v4  ;;  %v189_v38 = vmul.f32 %v2850_v1, %v86_v5  ;;  %v94_v51 = vld [vmem:[%s5382_s1 + $0x268] sm:$0xff]  ;;  %v93_v5 = vld [vmem:[%s5382_s1 + $0x260] sm:$0xff] }
  0x1e   :  { %254 = vadd.xlane.f32.xlu0 %v2959_v58  ;;  %v3180_v58 = vsel %vm216_vm0, %v172_v22, 0.0  ;;  %v183_v62 = vmul.f32 %v2850_v1, %v80_v57  ;;  %v185_v22 = vmul.f32 %v2850_v1, %v82_v50  ;;  %v3249_v27 = vsel %vm216_vm0, %v182_v16, 0.0  ;;  %v90_v57 = vld [vmem:[%s5382_s1 + $0x248] sm:$0xff]  ;;  %v91_v50 = vld [vmem:[%s5382_s1 + $0x250] sm:$0xff] }
  0x1f   :  { %v3264_v43 = vsel %vm216_vm0, %v184_v25, 0.0  ;;  %v188_v45 = vmul.f32 %v2850_v1, %v85_v18  ;;  %v3286_v53 = vsel %vm216_vm0, %v189_v38, 0.0  ;;  %v190_v4 = vmul.f32 %v2850_v1, %v87_v26  ;;  %v98_v38 = vld [vmem:[%s5382_s1 + $0x288] sm:$0xff] }
  0x20   :  { %v3241_v19 = vsel %vm216_vm0, %v183_v62, 0.0  ;;  %v3261_v42 = vsel %vm216_vm0, %v185_v22, 0.0  ;;  %v3283_v62 = vsel %vm216_vm0, %v186_v35, 0.0  ;;  %v193_v18 = vmul.f32 %v2850_v1, %v90_v57  ;;  %v95_v22 = vld [vmem:[%s5382_s1 + $0x270] sm:$0xff]  ;;  %v97_v57 = vld [vmem:[%s5382_s1 + $0x280] sm:$0xff] }
  0x21   :  { %263 = vadd.xlane.f32.xlu1 %v2972_v63  ;;  %v88_v63 = vld [vmem:[%s5382_s1 + $0x238] sm:$0xff]  ;;  %v3307_v25 = vsel %vm216_vm0, %v190_v4, 0.0  ;;  %v195_v26 = vmul.f32 %v2850_v1, %v92_v49  ;;  %v197_v35 = vmul.f32 %v2850_v1, %v94_v51  ;;  %v99_v51 = vld [vmem:[%s5382_s1 + $0x290] sm:$0xff] }
  0x22   :  { %260 = vadd.xlane.f32.xlu0 %v2975_v0  ;;  %v3238_v0 = vsel %vm216_vm0, %v180_v61, 0.0  ;;  %v191_v46 = vmul.f32 %v2850_v1, %v88_v63  ;;  %v3280_v61 = vsel %vm216_vm0, %v187_v28, 0.0  ;;  %v192_v63 = vmul.f32 %v2850_v1, %v89_v40 }
  0x23   :  { %v194_v28 = vmul.f32 %v2850_v1, %v91_v50  ;;  %v3319_v40 = vsel %vm216_vm0, %v193_v18, 0.0  ;;  %v100_v50 = vld [vmem:[%s5382_s1 + $0x298] sm:$0xff]  ;;  %v3335_v4 = vsel %vm216_vm0, %v195_v26, 0.0 }
  0x24   :  { %v3299_v16 = vsel %vm216_vm0, %v191_v46, 0.0  ;;  %v196_v46 = vmul.f32 %v2850_v1, %v93_v5  ;;  %v3341_v5 = vsel %vm216_vm0, %v197_v35, 0.0  ;;  %v200_v35 = vmul.f32 %v2850_v1, %v97_v57 }
  0x25   :  { %269 = vadd.xlane.f32.xlu1 %v2978_v2  ;;  %v96_v2 = vld [vmem:[%s5382_s1 + $0x278] sm:$0xff]  ;;  %v3338_v18 = vsel %vm216_vm0, %v194_v28, 0.0  ;;  %5387 = vst [vmem:[#allocation3_spill] sm:$0xff] %v3341_v5  ;;  %v201_v28 = vmul.f32 %v2850_v1, %v98_v38  ;;  %v41_v5 = vld [vmem:[%s5382_s1 + $0xc0] sm:$0xff] }
  0x26   :  { %266 = vadd.xlane.f32.xlu0 %v2990_v6  ;;  %v3296_v6 = vsel %vm216_vm0, %v188_v45, 0.0  ;;  %v3322_v45 = vsel %vm216_vm0, %v192_v63, 0.0  ;;  %v199_v49 = vmul.f32 %v2850_v1, %v96_v2  ;;  %5386 = vst [vmem:[#allocation2_spill] sm:$0xff] %v3338_v18  ;;  %v198_v2 = vmul.f32 %v2850_v1, %v95_v22  ;;  %v102_v63 = vld [vmem:[%s5382_s1 + $0x2a8] sm:$0xff] }
  0x27   :  { %v42_v22 = vld [vmem:[%s5382_s1 + $0xc8] sm:$0xff]  ;;  %v3371_v38 = vsel %vm216_vm0, %v201_v28, 0.0  ;;  %v3374_v57 = vsel %vm216_vm0, %v200_v35, 0.0  ;;  %v283_v28 = vsel %vm216_vm0, %v3011_v13, 0.0  ;;  %v103_v13 = vld [vmem:[%s5382_s1 + $0x2b0] sm:$0xff] }
  0x28   :  { %v3354_v26 = vsel %vm216_vm0, %v199_v49, 0.0  ;;  %v3365_v18 = vsel %vm216_vm0, %v198_v2, 0.0  ;;  %v202_v49 = vmul.f32 %v2850_v1, %v99_v51  ;;  %v286_v2 = vsel %vm216_vm0, %v2999_v9, 0.0  ;;  %v44_v9 = vld [vmem:[%s5382_s1 + $0xd8] sm:$0xff] }
  0x29   :  { %275 = vadd.xlane.f32.xlu1 %v2993_v7  ;;  %v101_v7 = vld [vmem:[%s5382_s1 + $0x2a0] sm:$0xff]  ;;  %5389 = vst [vmem:[#allocation5_spill] sm:$0xff] %v3354_v26  ;;  %v205_v26 = vmul.f32 %v2850_v1, %v102_v63 }
  0x2a   :  { %272 = vadd.xlane.f32.xlu0 %v2996_v8  ;;  %v3351_v8 = vsel %vm216_vm0, %v196_v46, 0.0  ;;  %v203_v46 = vmul.f32 %v2850_v1, %v100_v50  ;;  %v3385_v51 = vsel %vm216_vm0, %v202_v49, 0.0 }
  0x2b   :  { %5388 = vst [vmem:[#allocation4_spill] sm:$0xff] %v3351_v8  ;;  %v204_v8 = vmul.f32 %v2850_v1, %v101_v7  ;;  %5390 = vst [vmem:[#allocation6_spill] sm:$0xff] %v3385_v51  ;;  %v3388_v63 = vsel %vm216_vm0, %v205_v26, 0.0  ;;  %v145_v7 = vmul.f32 %v2850_v1, %v42_v22  ;;  %v104_v26 = vld [vmem:[%s5382_s1 + $0x2b8] sm:$0xff]  ;;  %v206_v22 = vmul.f32 %v2850_v1, %v103_v13 }
  0x2c   :  { %v3382_v50 = vsel %vm216_vm0, %v203_v46, 0.0  ;;  %5391 = vst [vmem:[#allocation7_spill] sm:$0xff] %v3388_v63  ;;  %v147_v46 = vmul.f32 %v2850_v1, %v44_v9  ;;  %v46_v63 = vld [vmem:[%s5382_s1 + $0xe8] sm:$0xff] }
  0x2d   :  { %281 = vadd.xlane.f32.xlu1 %v3008_v12  ;;  %v144_v12 = vmul.f32 %v2850_v1, %v41_v5  ;;  %v3401_v35 = vsel %vm216_vm0, %v204_v8, 0.0  ;;  %v207_v5 = vmul.f32 %v2850_v1, %v104_v26  ;;  %v292_v8 = vsel %vm216_vm0, %v145_v7, 0.0  ;;  %v45_v26 = vld [vmem:[%s5382_s1 + $0xe0] sm:$0xff] }
  0x2e   :  { %278 = vadd.xlane.f32.xlu0 %v3019_v17  ;;  %v43_v17 = vld [vmem:[%s5382_s1 + $0xd0] sm:$0xff]  ;;  %5392 = vst [vmem:[#allocation8_spill] sm:$0xff] %v3401_v35  ;;  %v105_v7 = vld [vmem:[%s5382_s1 + $0x2c0] sm:$0xff] }
  0x2f   :  { %v146_v49 = vmul.f32 %v2850_v1, %v43_v17  ;;  %v289_v35 = vsel %vm216_vm0, %v144_v12, 0.0  ;;  %v3422_v13 = vsel %vm216_vm0, %v207_v5, 0.0  ;;  %v208_v9 = vmul.f32 %v2850_v1, %v105_v7 }
  0x30   :  { %5393 = vst [vmem:[#allocation9_spill] sm:$0xff] %v3422_v13  ;;  %v149_v17 = vmul.f32 %v2850_v1, %v46_v63  ;;  %v148_v5 = vmul.f32 %v2850_v1, %v45_v26  ;;  %v48_v13 = vld [vmem:[%s5382_s1 + $0xf8] sm:$0xff]  ;;  %v47_v63 = vld [vmem:[%s5382_s1 + $0xf0] sm:$0xff] }
  0x31   :  { %287 = vadd.xlane.f32.xlu1 %v286_v2  ;;  %v3425_v2 = vsel %vm216_vm0, %v206_v22, 0.0  ;;  %v298_v22 = vsel %vm216_vm0, %v147_v46, 0.0  ;;  %v107_v46 = vld [vmem:[%s5382_s1 + $0x2d0] sm:$0xff]  ;;  %v151_v7 = vmul.f32 %v2850_v1, %v48_v13 }
  0x32   :  { %284 = vadd.xlane.f32.xlu0 %v283_v28  ;;  %5394 = vst [vmem:[#allocation10_spill] sm:$0xff] %v3425_v2  ;;  %v106_v28 = vld [vmem:[%s5382_s1 + $0x2c8] sm:$0xff]  ;;  %v295_v2 = vsel %vm216_vm0, %v146_v49, 0.0  ;;  %v304_v26 = vsel %vm216_vm0, %v149_v17, 0.0 }
  0x33   :  { %v209_v12 = vmul.f32 %v2850_v1, %v106_v28  ;;  %v3446_v28 = vsel %vm216_vm0, %v208_v9, 0.0  ;;  %v150_v9 = vmul.f32 %v2850_v1, %v47_v63 }
  0x34   :  { %5396 = vst [vmem:[#allocation12_spill] sm:$0xff] %v3446_v28 }
  0x35   :  { %293 = vadd.xlane.f32.xlu1 %v292_v8  ;;  %v3443_v51 = vsel %vm216_vm0, %v209_v12, 0.0  ;;  %v210_v8 = vmul.f32 %v2850_v1, %v107_v46  ;;  %v301_v12 = vsel %vm216_vm0, %v148_v5, 0.0  ;;  %v310_v5 = vsel %vm216_vm0, %v151_v7, 0.0 }
  0x36   :  { %290 = vadd.xlane.f32.xlu0 %v289_v35  ;;  %5395 = vst [vmem:[#allocation11_spill] sm:$0xff] %v3443_v51  ;;  %v108_v35 = vld [vmem:[%s5382_s1 + $0x2d8] sm:$0xff] }
  0x37   :  { %v211_v49 = vmul.f32 %v2850_v1, %v108_v35  ;;  %v3467_v51 = vsel %vm216_vm0, %v210_v8, 0.0  ;;  %v110_v35 = vld [vmem:[%s5382_s1 + $0x2e8] sm:$0xff]  ;;  %v111_v8 = vld [vmem:[%s5382_s1 + $0x2f0] sm:$0xff] }
  0x38   :  { %v213_v13 = vmul.f32 %v2850_v1, %v110_v35  ;;  %v214_v7 = vmul.f32 %v2850_v1, %v111_v8 }
  0x39   :  { %299 = vadd.xlane.f32.xlu1 %v298_v22  ;;  %v3464_v28 = vsel %vm216_vm0, %v211_v49, 0.0  ;;  %v307_v22 = vsel %vm216_vm0, %v150_v9, 0.0  ;;  %v112_v49 = vld [vmem:[%s5382_s1 + $0x2f8] sm:$0xff] }
  0x3a   :  { %296 = vadd.xlane.f32.xlu0 %v295_v2  ;;  %v109_v2 = vld [vmem:[%s5382_s1 + $0x2e0] sm:$0xff]  ;;  %v3480_v63 = vsel %vm216_vm0, %v213_v13, 0.0  ;;  %v3497_v9 = vsel %vm216_vm0, %v214_v7, 0.0 }
  0x3b   :  { %v212_v17 = vmul.f32 %v2850_v1, %v109_v2 }
  0x3d   :  { %305 = vadd.xlane.f32.xlu1 %v304_v26  ;;  %v3483_v46 = vsel %vm216_vm0, %v212_v17, 0.0  ;;  %v215_v26 = vmul.f32 %v2850_v1, %v112_v49  ;;  %v2818_v1 = vmov 0  }
  0x3e   :  { %302 = vadd.xlane.f32.xlu0 %v301_v12  ;;  %2433 = vset.pattern.permute.xlu1 %v2818_v1 }
  0x3f   :  { %v3494_v12 = vsel %vm216_vm0, %v215_v26, 0.0  ;;  %2432 = vset.pattern.permute.xlu0 %v2818_v1 }
  0x41   :  { %311 = vadd.xlane.f32.xlu1 %v310_v5  ;;  %v516_v5 = vld [vmem:[%s5383_s2 + $0x58] sm:$0xff] }
  0x42   :  { %308 = vadd.xlane.f32.xlu0 %v307_v22 }
  0x45   :  { %317 = vadd.xlane.f32.xlu1 %v3031_v23 }
  0x46   :  { %314 = vadd.xlane.f32.xlu0 %v3034_v24 }
  0x49   :  { %323 = vadd.xlane.f32.xlu1 %v3048_v30 }
  0x4a   :  { %320 = vadd.xlane.f32.xlu0 %v3051_v31 }
  0x4d   :  { %329 = vadd.xlane.f32.xlu1 %v3054_v32  ;;  %v5397_v32 = vld [vmem:[#allocation2_spill] sm:$0xff] }
  0x4e   :  { %326 = vadd.xlane.f32.xlu0 %v3064_v36 }
  0x51   :  { %335 = vadd.xlane.f32.xlu1 %v3067_v37 }
  0x52   :  { %332 = vadd.xlane.f32.xlu0 %v3075_v41  ;;  %v5398_v41 = vld [vmem:[#allocation3_spill] sm:$0xff] }
  0x55   :  { %341 = vadd.xlane.f32.xlu1 %v3087_v47  ;;  %v5399_v47 = vld [vmem:[#allocation4_spill] sm:$0xff] }
  0x56   :  { %338 = vadd.xlane.f32.xlu0 %v3090_v48 }
  0x59   :  { %347 = vadd.xlane.f32.xlu1 %v3106_v55 }
  0x5a   :  { %344 = vadd.xlane.f32.xlu0 %v3109_v59  ;;  %v5400_v59 = vld [vmem:[#allocation5_spill] sm:$0xff] }
  0x5d   :  { %353 = vadd.xlane.f32.xlu1 %v3112_v60 }
  0x5e   :  { %350 = vadd.xlane.f32.xlu0 %v3122_v56 }
  0x61   :  { %359 = vadd.xlane.f32.xlu1 %v3125_v3 }
  0x62   :  { %356 = vadd.xlane.f32.xlu0 %v3133_v11 }
  0x65   :  { %365 = vadd.xlane.f32.xlu1 %v3145_v20  ;;  %v507_v20 = vld [vmem:[%s5383_s2 + $0x10] sm:$0xff] }
  0x66   :  { %362 = vadd.xlane.f32.xlu0 %v3148_v21  ;;  %v505_v21 = vld [vmem:[%s5383_s2] sm:$0xff] }
  0x69   :  { %371 = vadd.xlane.f32.xlu1 %v3164_v29  ;;  %v5401_v29 = vld [vmem:[#allocation6_spill] sm:$0xff] }
  0x6a   :  { %368 = vadd.xlane.f32.xlu0 %v3167_v33  ;;  %v506_v33 = vld [vmem:[%s5383_s2 + $0x8] sm:$0xff] }
  0x6d   :  { %377 = vadd.xlane.f32.xlu1 %v3170_v34 }
  0x6e   :  { %374 = vadd.xlane.f32.xlu0 %v3180_v58 }
  0x71   :  { %383 = vadd.xlane.f32.xlu1 %v3183_v39 }
  0x72   :  { %380 = vadd.xlane.f32.xlu0 %v3191_v44 }
  0x75   :  { %389 = vadd.xlane.f32.xlu1 %v3203_v52  ;;  %v508_v52 = vld [vmem:[%s5383_s2 + $0x18] sm:$0xff] }
  0x76   :  { %386 = vadd.xlane.f32.xlu0 %v3206_v54 }
  0x79   :  { %395 = vadd.xlane.f32.xlu1 %v3222_v10  ;;  %v5402_v10 = vld [vmem:[#allocation7_spill] sm:$0xff] }
  0x7a   :  { %392 = vadd.xlane.f32.xlu0 %v3225_v14  ;;  %v5403_v14 = vld [vmem:[#allocation8_spill] sm:$0xff] }
  0x7d   :  { %401 = vadd.xlane.f32.xlu1 %v3228_v15 }
  0x7e   :  { %398 = vadd.xlane.f32.xlu0 %v3238_v0 }
  0x81   :  { %407 = vadd.xlane.f32.xlu1 %v3241_v19 }
  0x82   :  { %404 = vadd.xlane.f32.xlu0 %v3249_v27 }
  0x85   :  { %413 = vadd.xlane.f32.xlu1 %v3261_v42 }
  0x86   :  { %410 = vadd.xlane.f32.xlu0 %v3264_v43  ;;  %v510_v43 = vld [vmem:[%s5383_s2 + $0x28] sm:$0xff] }
  0x89   :  { %419 = vadd.xlane.f32.xlu1 %v3280_v61 }
  0x8a   :  { %416 = vadd.xlane.f32.xlu0 %v3283_v62  ;;  %v5404_v62 = vld [vmem:[#allocation9_spill] sm:$0xff] }
  0x8d   :  { %425 = vadd.xlane.f32.xlu1 %v3286_v53  ;;  %v5405_v53 = vld [vmem:[#allocation10_spill] sm:$0xff] }
  0x8e   :  { %422 = vadd.xlane.f32.xlu0 %v3296_v6  ;;  %v509_v6 = vld [vmem:[%s5383_s2 + $0x20] sm:$0xff] }
  0x91   :  { %431 = vadd.xlane.f32.xlu1 %v3299_v16 }
  0x92   :  { %428 = vadd.xlane.f32.xlu0 %v3307_v25  ;;  %v225_v23 = vpop.xlane.xlu1 %224 }
  0x93   :  { %v219_v24 = vpop.xlane.xlu0 %218  ;;  %v603_v39 = vadd.f32 %v507_v20, %v225_v23  ;;  %v518_v23 = vld [vmem:[%s5383_s2 + $0x68] sm:$0xff] }
  0x94   :  { %v601_v44 = vadd.f32 %v505_v21, %v219_v24  ;;  %v515_v21 = vld [vmem:[%s5383_s2 + $0x50] sm:$0xff] }
  0x95   :  { %437 = vadd.xlane.f32.xlu1 %v3319_v40  ;;  %v2337_v19 = vmul.f32 -1.442695, %v603_v39 }
  0x96   :  { %434 = vadd.xlane.f32.xlu0 %v3322_v45  ;;  %v228_v30 = vpop.xlane.xlu1 %227  ;;  %v2335_v42 = vmul.f32 -1.442695, %v601_v44 }
  0x97   :  { %v222_v31 = vpop.xlane.xlu0 %221  ;;  %v604_v27 = vadd.f32 %v508_v52, %v228_v30  ;;  %2434 = vpow2.f32 %v2337_v19 }
  0x98   :  { %v602_v54 = vadd.f32 %v506_v33, %v222_v31  ;;  %2436 = vpow2.f32 %v2335_v42 }
  0x99   :  { %443 = vadd.xlane.f32.xlu1 %v3335_v4  ;;  %v2338_v45 = vmul.f32 -1.442695, %v604_v27  ;;  %v514_v4 = vld [vmem:[%s5383_s2 + $0x48] sm:$0xff] }
  0x9a   :  { %440 = vadd.xlane.f32.xlu0 %v5397_v32  ;;  %v234_v36 = vpop.xlane.xlu1 %233  ;;  %v2336_v61 = vmul.f32 -1.442695, %v602_v54  ;;  %v517_v54 = vld [vmem:[%s5383_s2 + $0x60] sm:$0xff] }
  0x9b   :  { %v231_v37 = vpop.xlane.xlu0 %230  ;;  %v606_v40 = vadd.f32 %v510_v43, %v234_v36 }
  0x9c   :  { %2438 = vpow2.f32 %v2336_v61 }
  0x9d   :  { %449 = vadd.xlane.f32.xlu1 %v5398_v41  ;;  %v2340_v13 = vmul.f32 -1.442695, %v606_v40  ;;  %2440 = vpow2.f32 %v2338_v45  ;;  %v513_v41 = vld [vmem:[%s5383_s2 + $0x40] sm:$0xff] }
  0x9e   :  { %446 = vadd.xlane.f32.xlu0 %v5399_v47  ;;  %v240_v48 = vpop.xlane.xlu1 %239 }
  0x9f   :  { %v3545_v55 = vpop.xlane.xlu0 %236  ;;  %2442 = vpow2.f32 %v2340_v13 }
  0xa1   :  { %455 = vadd.xlane.f32.xlu1 %v5400_v59  ;;  %v2435_v24 = vpop.eup %2434 }
  0xa2   :  { %452 = vadd.xlane.f32.xlu0 %v3365_v18  ;;  %v246_v60 = vpop.xlane.xlu1 %245  ;;  %v605_v18 = vadd.f32 %v509_v6, %v231_v37  ;;  %v519_v6 = vld [vmem:[%s5383_s2 + $0x70] sm:$0xff] }
  0xa3   :  { %v3549_v56 = vpop.xlane.xlu0 %242  ;;  %v610_v17 = vadd.f32 %v514_v4, %v246_v60 }
  0xa4   :  { %v2339_v49 = vmul.f32 -1.442695, %v605_v18  ;;  %v609_v20 = vadd.f32 %v513_v41, %v3549_v56 }
  0xa5   :  { %461 = vadd.xlane.f32.xlu1 %v3371_v38  ;;  %v5406_v38 = vld [vmem:[#allocation11_spill] sm:$0xff]  ;;  %v2344_v7 = vmul.f32 -1.442695, %v610_v17 }
  0xa6   :  { %458 = vadd.xlane.f32.xlu0 %v3374_v57  ;;  %v252_v3 = vpop.xlane.xlu1 %251  ;;  %v5407_v57 = vld [vmem:[#allocation12_spill] sm:$0xff]  ;;  %2444 = vpow2.f32 %v2339_v49  ;;  %v2343_v52 = vmul.f32 -1.442695, %v609_v20  ;;  %v530_v20 = vld [vmem:[%s5383_s2 + $0xc8] sm:$0xff] }
  0xa7   :  { %v3553_v11 = vpop.xlane.xlu0 %248  ;;  %v612_v1 = vadd.f32 %v516_v5, %v252_v3  ;;  %2446 = vpow2.f32 %v2344_v7 }
  0xa8   :  { %v611_v44 = vadd.f32 %v515_v21, %v3553_v11  ;;  %v524_v11 = vld [vmem:[%s5383_s2 + $0x98] sm:$0xff] }
  0xa9   :  { %467 = vadd.xlane.f32.xlu1 %v3382_v50  ;;  %v512_v50 = vld [vmem:[%s5383_s2 + $0x38] sm:$0xff]  ;;  %v2346_v37 = vmul.f32 -1.442695, %v612_v1 }
  0xaa   :  { %464 = vadd.xlane.f32.xlu0 %v5401_v29  ;;  %v258_v34 = vpop.xlane.xlu1 %257  ;;  %v608_v22 = vadd.f32 %v512_v50, %v240_v48  ;;  %v987_v48 = vadd.f32 1.0, %v2435_v24  ;;  %v2345_v61 = vmul.f32 -1.442695, %v611_v44 }
  0xab   :  { %v3566_v58 = vpop.xlane.xlu0 %254  ;;  %v614_v47 = vadd.f32 %v518_v23, %v258_v34 }
  0xac   :  { %v2342_v30 = vmul.f32 -1.442695, %v608_v22 }
  0xad   :  { %473 = vadd.xlane.f32.xlu1 %v5402_v10  ;;  %v2348_v33 = vmul.f32 -1.442695, %v614_v47 }
  0xae   :  { %470 = vadd.xlane.f32.xlu0 %v5403_v14  ;;  %v3573_v15 = vpop.xlane.xlu1 %263  ;;  %2448 = vpow2.f32 %v2342_v30  ;;  %v523_v30 = vld [vmem:[%s5383_s2 + $0x90] sm:$0xff] }
  0xaf   :  { %v3575_v0 = vpop.xlane.xlu0 %260  ;;  %2450 = vpow2.f32 %v2346_v37 }
  0xb0   :  { %2452 = vrcp.f32 %v987_v48  ;;  %v615_v17 = vadd.f32 %v519_v6, %v3575_v0 }
  0xb1   :  { %479 = vadd.xlane.f32.xlu1 %v5404_v62  ;;  %v613_v62 = vadd.f32 %v517_v54, %v3566_v58 }
  0xb2   :  { %476 = vadd.xlane.f32.xlu0 %v5405_v53  ;;  %v3585_v16 = vpop.xlane.xlu1 %269 }
  0xb3   :  { %v3587_v25 = vpop.xlane.xlu0 %266  ;;  %v2347_v13 = vmul.f32 -1.442695, %v613_v62 }
  0xb5   :  { %485 = vadd.xlane.f32.xlu1 %v5406_v38  ;;  %v521_v38 = vld [vmem:[%s5383_s2 + $0x80] sm:$0xff] }
  0xb6   :  { %482 = vadd.xlane.f32.xlu0 %v5407_v57  ;;  %v3597_v35 = vpop.xlane.xlu1 %275  ;;  %v526_v57 = vld [vmem:[%s5383_s2 + $0xa8] sm:$0xff] }
  0xb7   :  { %v3599_v2 = vpop.xlane.xlu0 %272  ;;  %v620_v18 = vadd.f32 %v524_v11, %v3597_v35  ;;  %v617_v35 = vadd.f32 %v521_v38, %v3587_v25  ;;  %v528_v25 = vld [vmem:[%s5383_s2 + $0xb8] sm:$0xff] }
  0xb8   :  { %v619_v47 = vadd.f32 %v523_v30, %v3599_v2 }
  0xb9   :  { %491 = vadd.xlane.f32.xlu1 %v3464_v28  ;;  %v511_v28 = vld [vmem:[%s5383_s2 + $0x30] sm:$0xff]  ;;  %v2354_v23 = vmul.f32 -1.442695, %v620_v18  ;;  %v2351_v41 = vmul.f32 -1.442695, %v617_v35  ;;  %v534_v18 = vld [vmem:[%s5383_s2 + $0xe8] sm:$0xff] }
  0xba   :  { %488 = vadd.xlane.f32.xlu0 %v3467_v51  ;;  %v3606_v8 = vpop.xlane.xlu1 %281  ;;  %v2437_v51 = vpop.eup %2436  ;;  %v607_v59 = vadd.f32 %v511_v28, %v3545_v55  ;;  %v529_v35 = vld [vmem:[%s5383_s2 + $0xc0] sm:$0xff] }
  0xbb   :  { %v3608_v26 = vpop.xlane.xlu0 %278  ;;  %v2439_v36 = vpop.eup %2438  ;;  %v622_v24 = vadd.f32 %v526_v57, %v3606_v8 }
  0xbc   :  { %v2441_v60 = vpop.eup %2440  ;;  %v986_v3 = vadd.f32 1.0, %v2439_v36  ;;  %v2349_v36 = vmul.f32 -1.442695, %v615_v17 }
  0xbd   :  { %497 = vadd.xlane.f32.xlu1 %v3480_v63  ;;  %v520_v63 = vld [vmem:[%s5383_s2 + $0x78] sm:$0xff]  ;;  %v2443_v39 = vpop.eup %2442  ;;  %v988_v56 = vadd.f32 1.0, %v2441_v60 }
  0xbe   :  { %494 = vadd.xlane.f32.xlu0 %v3483_v46  ;;  %v3618_v31 = vpop.xlane.xlu1 %287  ;;  %v985_v46 = vadd.f32 1.0, %v2437_v51  ;;  %v616_v34 = vadd.f32 %v520_v63, %v3573_v15  ;;  %v2445_v15 = vpop.eup %2444  ;;  %v990_v42 = vadd.f32 1.0, %v2443_v39  ;;  %v2356_v63 = vmul.f32 -1.442695, %v622_v24  ;;  %v536_v24 = vld [vmem:[%s5383_s2 + $0xf8] sm:$0xff] }
  0xbf   :  { %v3620_v32 = vpop.xlane.xlu0 %284  ;;  %v2447_v43 = vpop.eup %2446  ;;  %v989_v53 = vadd.f32 1.0, %v2445_v15  ;;  %v532_v15 = vld [vmem:[%s5383_s2 + $0xd8] sm:$0xff] }
  0xc0   :  { %2454 = vrcp.f32 %v985_v46  ;;  %v2350_v19 = vmul.f32 -1.442695, %v616_v34  ;;  %v2449_v45 = vpop.eup %2448  ;;  %v994_v58 = vadd.f32 1.0, %v2447_v43  ;;  %v624_v46 = vadd.f32 %v528_v25, %v3618_v31 }
  0xc1   :  { %503 = vadd.xlane.f32.xlu1 %v3494_v12  ;;  %v2341_v12 = vmul.f32 -1.442695, %v607_v59  ;;  %2456 = vrcp.f32 %v986_v3  ;;  %v2451_v50 = vpop.eup %2450  ;;  %v992_v22 = vadd.f32 1.0, %v2449_v45  ;;  %v2353_v34 = vmul.f32 -1.442695, %v619_v47  ;;  %v531_v47 = vld [vmem:[%s5383_s2 + $0xd0] sm:$0xff] }
  0xc2   :  { %500 = vadd.xlane.f32.xlu0 %v3497_v9  ;;  %v3635_v29 = vpop.xlane.xlu1 %293  ;;  %v522_v9 = vld [vmem:[%s5383_s2 + $0x88] sm:$0xff]  ;;  %2458 = vpow2.f32 %v2348_v33  ;;  %v2453_v5 = vpop.eup %2452  ;;  %v996_v0 = vadd.f32 1.0, %v2451_v50 }
  0xc3   :  { %v3637_v55 = vpop.xlane.xlu0 %290  ;;  %v618_v27 = vadd.f32 %v522_v9, %v3585_v16  ;;  %2460 = vpow2.f32 %v2341_v12  ;;  %v525_v12 = vld [vmem:[%s5383_s2 + $0xa0] sm:$0xff]  ;;  %v626_v44 = vadd.f32 %v530_v20, %v3635_v29  ;;  %v527_v29 = vld [vmem:[%s5383_s2 + $0xb0] sm:$0xff] }
  0xc4   :  { %2462 = vrcp.f32 %v988_v56  ;;  %v2358_v56 = vmul.f32 -1.442695, %v624_v46  ;;  %v623_v57 = vadd.f32 %v527_v29, %v3620_v32 }
  0xc5   :  { %2464 = vpow2.f32 %v2343_v52  ;;  %v2352_v4 = vmul.f32 -1.442695, %v618_v27  ;;  %v2360_v6 = vmul.f32 -1.442695, %v626_v44 }
  0xc6   :  { %v3647_v10 = vpop.xlane.xlu1 %299  ;;  %2466 = vpow2.f32 %v2350_v19 }
  0xc7   :  { %v3649_v14 = vpop.xlane.xlu0 %296  ;;  %2468 = vrcp.f32 %v990_v42  ;;  %v621_v42 = vadd.f32 %v525_v12, %v3608_v26  ;;  %v628_v45 = vadd.f32 %v532_v15, %v3647_v10 }
  0xc8   :  { %2470 = vpow2.f32 %v2345_v61 }
  0xc9   :  { %2472 = vrcp.f32 %v989_v53 }
  0xca   :  { %v3659_v40 = vpop.xlane.xlu1 %305  ;;  %v2455_v1 = vpop.eup %2454  ;;  %2474 = vpow2.f32 %v2352_v4 }
  0xcb   :  { %v3661_v16 = vpop.xlane.xlu0 %302  ;;  %v2457_v28 = vpop.eup %2456  ;;  %2476 = vrcp.f32 %v994_v58  ;;  %v2355_v58 = vmul.f32 -1.442695, %v621_v42 }
  0xcc   :  { %v2459_v51 = vpop.eup %2458  ;;  %2478 = vpow2.f32 %v2347_v13 }
  0xcd   :  { %v2461_v37 = vpop.eup %2460  ;;  %2480 = vrcp.f32 %v992_v22  ;;  %v998_v3 = vadd.f32 1.0, %v2459_v51  ;;  %v2362_v22 = vmul.f32 -1.442695, %v628_v45  ;;  %v625_v51 = vadd.f32 %v529_v35, %v3637_v55  ;;  %v538_v55 = vld [vmem:[%s5383_s2 + $0x108] sm:$0xff] }
  0xce   :  { %v3672_v49 = vpop.xlane.xlu1 %311  ;;  %v2463_v59 = vpop.eup %2462  ;;  %2482 = vpow2.f32 %v2354_v23  ;;  %v991_v33 = vadd.f32 1.0, %v2461_v37 }
  0xcf   :  { %v3674_v7 = vpop.xlane.xlu0 %308  ;;  %v2465_v60 = vpop.eup %2464  ;;  %2484 = vrcp.f32 %v996_v0 }
  0xd0   :  { %v2467_v21 = vpop.eup %2466  ;;  %2486 = vpow2.f32 %v2349_v36  ;;  %v993_v27 = vadd.f32 1.0, %v2465_v60 }
  0xd1   :  { %v3692_v2 = vpop.eup %2468  ;;  %2488 = vpow2.f32 %v2351_v41  ;;  %v1000_v54 = vadd.f32 1.0, %v2467_v21  ;;  %v2359_v21 = vmul.f32 -1.442695, %v625_v51 }
  0xd2   :  { %v3684_v8 = vpop.xlane.xlu1 %317  ;;  %1472 = vperm.xlu1 %2433, %v2457_v28   ;;  %v2471_v39 = vpop.eup %2470  ;;  %2490 = vpow2.f32 %v2356_v63  ;;  %v2357_v28 = vmul.f32 -1.442695, %v623_v57 }
  0xd3   :  { %v3686_v48 = vpop.xlane.xlu0 %314  ;;  %v2473_v52 = vpop.eup %2472  ;;  %2492 = vrcp.f32 %v998_v3  ;;  %v995_v43 = vadd.f32 1.0, %v2471_v39 }
  0xd4   :  { %v2475_v19 = vpop.eup %2474  ;;  %2494 = vrcp.f32 %v991_v33  ;;  %v627_v33 = vadd.f32 %v531_v47, %v3649_v14  ;;  %v540_v14 = vld [vmem:[%s5383_s2 + $0x118] sm:$0xff] }
  0xd5   :  { %v2477_v11 = vpop.eup %2476  ;;  %2496 = vpow2.f32 %v2353_v34  ;;  %v1002_v26 = vadd.f32 1.0, %v2475_v19 }
  0xd6   :  { %v3697_v9 = vpop.xlane.xlu1 %323  ;;  %1477 = vperm.xlu1 %2433, %v2453_v5   ;;  %v2479_v53 = vpop.eup %2478  ;;  %2498 = vpow2.f32 %v2358_v56  ;;  %v634_v56 = vadd.f32 %v538_v55, %v3684_v8  ;;  %v2361_v42 = vmul.f32 -1.442695, %v627_v33  ;;  %v535_v8 = vld [vmem:[%s5383_s2 + $0xf0] sm:$0xff] }
  0xd7   :  { %v3699_v31 = vpop.xlane.xlu0 %320  ;;  %v3714_v4 = vpop.eup %2480  ;;  %2500 = vrcp.f32 %v1000_v54  ;;  %v997_v13 = vadd.f32 1.0, %v2479_v53 }
  0xd8   :  { %1467 = vperm.xlu0 %2432, %v2455_v1   ;;  %v2483_v38 = vpop.eup %2482  ;;  %2502 = vrcp.f32 %v993_v27  ;;  %v630_v1 = vadd.f32 %v534_v18, %v3659_v40  ;;  %v2368_v53 = vmul.f32 -1.442695, %v634_v56 }
  0xd9   :  { %v2485_v50 = vpop.eup %2484  ;;  %2504 = vrcp.f32 %v995_v43  ;;  %v1004_v32 = vadd.f32 1.0, %v2483_v38 }
  0xda   :  { %v3709_v61 = vpop.xlane.xlu1 %329  ;;  %1482 = vperm.xlu1 %2433, %v2463_v59   ;;  %v2487_v5 = vpop.eup %2486  ;;  %2506 = vpow2.f32 %v2360_v6  ;;  %v2364_v41 = vmul.f32 -1.442695, %v630_v1  ;;  %v632_v59 = vadd.f32 %v536_v24, %v3672_v49  ;;  %v533_v49 = vld [vmem:[%s5383_s2 + $0xe0] sm:$0xff]  ;;  %v636_v6 = vadd.f32 %v540_v14, %v3697_v9 }
  0xdb   :  { %v3711_v62 = vpop.xlane.xlu0 %326  ;;  %v2489_v23 = vpop.eup %2488  ;;  %2508 = vrcp.f32 %v1002_v26  ;;  %v999_v25 = vadd.f32 1.0, %v2487_v5  ;;  %v629_v19 = vadd.f32 %v533_v49, %v3661_v16  ;;  %v542_v26 = vld [vmem:[%s5383_s2 + $0x128] sm:$0xff]  ;;  %v537_v9 = vld [vmem:[%s5383_s2 + $0x100] sm:$0xff] }
  0xdc   :  { %1512 = vperm.xlu0 %2432, %v2477_v11   ;;  %v2491_v30 = vpop.eup %2490  ;;  %2510 = vpow2.f32 %v2355_v58  ;;  %v1001_v3 = vadd.f32 1.0, %v2489_v23  ;;  %v2366_v39 = vmul.f32 -1.442695, %v632_v59  ;;  %v638_v35 = vadd.f32 %v542_v26, %v3709_v61 }
  0xdd   :  { %v2493_v0 = vpop.eup %2492  ;;  %2512 = vrcp.f32 %v997_v13  ;;  %v1006_v46 = vadd.f32 1.0, %v2491_v30  ;;  %v2363_v38 = vmul.f32 -1.442695, %v629_v19  ;;  %v543_v19 = vld [vmem:[%s5383_s2 + $0x130] sm:$0xff] }
  0xde   :  { %v3720_v17 = vpop.xlane.xlu1 %335  ;;  %1487 = vperm.xlu1 %2433, %v2473_v52   ;;  %v2495_v37 = vpop.eup %2494  ;;  %2514 = vpow2.f32 %v2362_v22  ;;  %v2370_v22 = vmul.f32 -1.442695, %v636_v6  ;;  %v2372_v47 = vmul.f32 -1.442695, %v638_v35 }
  0xdf   :  { %v3722_v10 = vpop.xlane.xlu0 %332  ;;  %v2497_v63 = vpop.eup %2496  ;;  %2516 = vrcp.f32 %v1004_v32  ;;  %v544_v32 = vld [vmem:[%s5383_s2 + $0x138] sm:$0xff] }
  0xe0   :  { %1522 = vperm.xlu0 %2432, %v2485_v50   ;;  %v2499_v60 = vpop.eup %2498  ;;  %2518 = vpow2.f32 %v2357_v28  ;;  %v1003_v15 = vadd.f32 1.0, %v2497_v63  ;;  %v633_v28 = vadd.f32 %v537_v9, %v3686_v48  ;;  %v640_v59 = vadd.f32 %v544_v32, %v3720_v17  ;;  %v541_v63 = vld [vmem:[%s5383_s2 + $0x120] sm:$0xff] }
  0xe1   :  { %v2501_v20 = vpop.eup %2500  ;;  %2520 = vrcp.f32 %v999_v25  ;;  %v1008_v52 = vadd.f32 1.0, %v2499_v60  ;;  %v637_v17 = vadd.f32 %v541_v63, %v3711_v62 }
  0xe2   :  { %v3732_v36 = vpop.xlane.xlu1 %341  ;;  %1492 = vperm.xlu1 %2433, %v3692_v2   ;;  %v2503_v12 = vpop.eup %2502  ;;  %2522 = vpow2.f32 %v2364_v41  ;;  %v2367_v60 = vmul.f32 -1.442695, %v633_v28 }
  0xe3   :  { %v3735_v40 = vpop.xlane.xlu0 %338  ;;  %v2505_v44 = vpop.eup %2504  ;;  %2524 = vrcp.f32 %v1006_v46 }
  0xe4   :  { %1532 = vperm.xlu0 %2432, %v2493_v0   ;;  %v2507_v54 = vpop.eup %2506  ;;  %2526 = vrcp.f32 %v1001_v3 }
  0xe5   :  { %v2509_v27 = vpop.eup %2508  ;;  %2528 = vpow2.f32 %v2359_v21  ;;  %v1010_v45 = vadd.f32 1.0, %v2507_v54 }
  0xe6   :  { %v3748_v2 = vpop.xlane.xlu1 %347  ;;  %1497 = vperm.xlu1 %2433, %v2495_v37   ;;  %v2511_v29 = vpop.eup %2510  ;;  %2530 = vpow2.f32 %v2366_v39 }
  0xe7   :  { %v3750_v34 = vpop.xlane.xlu0 %344  ;;  %v2513_v16 = vpop.eup %2512  ;;  %2532 = vrcp.f32 %v1008_v52  ;;  %v1005_v57 = vadd.f32 1.0, %v2511_v29  ;;  %v548_v52 = vld [vmem:[%s5383_s2 + $0x158] sm:$0xff] }
  0xe8   :  { %1542 = vperm.xlu0 %2432, %v2501_v20   ;;  %v2515_v18 = vpop.eup %2514  ;;  %2534 = vrcp.f32 %v1003_v15  ;;  %v2371_v15 = vmul.f32 -1.442695, %v637_v17  ;;  %v644_v29 = vadd.f32 %v548_v52, %v3748_v2  ;;  %v545_v2 = vld [vmem:[%s5383_s2 + $0x140] sm:$0xff] }
  0xe9   :  { %v2517_v58 = vpop.eup %2516  ;;  %2536 = vpow2.f32 %v2361_v42  ;;  %v1012_v23 = vadd.f32 1.0, %v2515_v18  ;;  %v639_v18 = vadd.f32 %v543_v19, %v3722_v10  ;;  %v641_v32 = vadd.f32 %v545_v2, %v3735_v40  ;;  %v549_v17 = vld [vmem:[%s5383_s2 + $0x160] sm:$0xff] }
  0xea   :  { %v3760_v11 = vpop.xlane.xlu1 %353  ;;  %1502 = vperm.xlu1 %2433, %v3714_v4   ;;  %v631_v4 = vadd.f32 %v535_v8, %v3674_v7  ;;  %v2519_v5 = vpop.eup %2518  ;;  %2538 = vpow2.f32 %v2368_v53  ;;  %v539_v7 = vld [vmem:[%s5383_s2 + $0x110] sm:$0xff] }
  0xeb   :  { %v3763_v43 = vpop.xlane.xlu0 %350  ;;  %v2521_v1 = vpop.eup %2520  ;;  %2540 = vrcp.f32 %v1010_v45  ;;  %v1007_v61 = vadd.f32 1.0, %v2519_v5  ;;  %v635_v25 = vadd.f32 %v539_v7, %v3699_v31  ;;  %v546_v31 = vld [vmem:[%s5383_s2 + $0x148] sm:$0xff]  ;;  %v2378_v5 = vmul.f32 -1.442695, %v644_v29  ;;  %v552_v7 = vld [vmem:[%s5383_s2 + $0x178] sm:$0xff] }
  0xec   :  { %1552 = vperm.xlu0 %2432, %v2509_v27   ;;  %v2523_v24 = vpop.eup %2522  ;;  %2542 = vpow2.f32 %v2363_v38  ;;  %v2365_v30 = vmul.f32 -1.442695, %v631_v4  ;;  %v642_v39 = vadd.f32 %v546_v31, %v3732_v36 }
  0xed   :  { %v2525_v0 = vpop.eup %2524  ;;  %2544 = vrcp.f32 %v1005_v57  ;;  %v1014_v46 = vadd.f32 1.0, %v2523_v24  ;;  %v2369_v20 = vmul.f32 -1.442695, %v635_v25  ;;  %v547_v25 = vld [vmem:[%s5383_s2 + $0x150] sm:$0xff] }
  0xee   :  { %v3773_v50 = vpop.xlane.xlu1 %359  ;;  %1507 = vperm.xlu1 %2433, %v2503_v12   ;;  %v2527_v41 = vpop.eup %2526  ;;  %2546 = vpow2.f32 %v2370_v22  ;;  %v2374_v12 = vmul.f32 -1.442695, %v640_v59  ;;  %v2376_v8 = vmul.f32 -1.442695, %v642_v39  ;;  %v554_v59 = vld [vmem:[%s5383_s2 + $0x188] sm:$0xff] }
  0xef   :  { %v3775_v13 = vpop.xlane.xlu0 %356  ;;  %v2529_v48 = vpop.eup %2528  ;;  %2548 = vrcp.f32 %v1012_v23  ;;  %v2373_v23 = vmul.f32 -1.442695, %v639_v18 }
  0xf0   :  { %1562 = vperm.xlu0 %2432, %v2517_v58   ;;  %v2531_v55 = vpop.eup %2530  ;;  %2550 = vpow2.f32 %v2365_v30  ;;  %v1009_v62 = vadd.f32 1.0, %v2529_v48  ;;  %v2375_v48 = vmul.f32 -1.442695, %v641_v32 }
  0xf1   :  { %v2533_v3 = vpop.eup %2532  ;;  %2552 = vrcp.f32 %v1007_v61 }
  0xf2   :  { %v3786_v51 = vpop.xlane.xlu1 %365  ;;  %1517 = vperm.xlu1 %2433, %v2505_v44   ;;  %v2535_v49 = vpop.eup %2534  ;;  %2554 = vpow2.f32 %v2372_v47  ;;  %v1016_v44 = vadd.f32 1.0, %v2531_v55  ;;  %v643_v55 = vadd.f32 %v547_v25, %v3750_v34  ;;  %v556_v34 = vld [vmem:[%s5383_s2 + $0x198] sm:$0xff] }
  0xf3   :  { %v3788_v37 = vpop.xlane.xlu0 %362  ;;  %v2537_v56 = vpop.eup %2536  ;;  %2556 = vrcp.f32 %v1014_v46 }
  0xf4   :  { %1572 = vperm.xlu0 %2432, %v2525_v0   ;;  %v2539_v14 = vpop.eup %2538  ;;  %2558 = vpow2.f32 %v2367_v60  ;;  %v1011_v26 = vadd.f32 1.0, %v2537_v56 }
  0xf5   :  { %v2541_v54 = vpop.eup %2540  ;;  %2560 = vpow2.f32 %v2369_v20  ;;  %v1018_v6 = vadd.f32 1.0, %v2539_v14  ;;  %v2377_v14 = vmul.f32 -1.442695, %v643_v55 }
  0xf6   :  { %v3798_v21 = vpop.xlane.xlu1 %371  ;;  %1527 = vperm.xlu1 %2433, %v2513_v16   ;;  %v2543_v42 = vpop.eup %2542  ;;  %2562 = vpow2.f32 %v2374_v12  ;;  %v550_v16 = vld [vmem:[%s5383_s2 + $0x168] sm:$0xff] }
  0xf7   :  { %v3800_v33 = vpop.xlane.xlu0 %368  ;;  %v2545_v53 = vpop.eup %2544  ;;  %2564 = vrcp.f32 %v1016_v44  ;;  %v1013_v4 = vadd.f32 1.0, %v2543_v42  ;;  %v646_v22 = vadd.f32 %v550_v16, %v3760_v11 }
  0xf8   :  { %1582 = vperm.xlu0 %2432, %v2533_v3   ;;  %v2547_v45 = vpop.eup %2546  ;;  %2566 = vrcp.f32 %v1009_v62  ;;  %v645_v62 = vadd.f32 %v549_v17, %v3763_v43  ;;  %v558_v43 = vld [vmem:[%s5383_s2 + $0x1a8] sm:$0xff] }
  0xf9   :  { %v2549_v38 = vpop.eup %2548  ;;  %2568 = vpow2.f32 %v2371_v15  ;;  %v1020_v10 = vadd.f32 1.0, %v2547_v45  ;;  %v2380_v61 = vmul.f32 -1.442695, %v646_v22 }
  0xfa   :  { %v3809_v27 = vpop.xlane.xlu1 %377  ;;  %1537 = vperm.xlu1 %2433, %v2521_v1   ;;  %v2551_v9 = vpop.eup %2550  ;;  %2570 = vpow2.f32 %v2376_v8  ;;  %v652_v8 = vadd.f32 %v556_v34, %v3798_v21  ;;  %v2379_v18 = vmul.f32 -1.442695, %v645_v62  ;;  %v553_v21 = vld [vmem:[%s5383_s2 + $0x180] sm:$0xff] }
  0xfb   :  { %v3811_v36 = vpop.xlane.xlu0 %374  ;;  %v2553_v35 = vpop.eup %2552  ;;  %2572 = vrcp.f32 %v1018_v6  ;;  %v1015_v30 = vadd.f32 1.0, %v2551_v9 }
  0xfc   :  { %1592 = vperm.xlu0 %2432, %v2541_v54   ;;  %v2555_v1 = vpop.eup %2554  ;;  %2574 = vrcp.f32 %v1011_v26  ;;  %v2386_v9 = vmul.f32 -1.442695, %v652_v8 }
  0xfd   :  { %v2557_v24 = vpop.eup %2556  ;;  %2576 = vrcp.f32 %v1013_v4  ;;  %v1022_v40 = vadd.f32 1.0, %v2555_v1  ;;  %v649_v1 = vadd.f32 %v553_v21, %v3788_v37  ;;  %v557_v37 = vld [vmem:[%s5383_s2 + $0x1a0] sm:$0xff] }
  0xfe   :  { %v3821_v58 = vpop.xlane.xlu1 %383  ;;  %1547 = vperm.xlu1 %2433, %v2527_v41   ;;  %v2559_v0 = vpop.eup %2558  ;;  %2578 = vpow2.f32 %v2378_v5  ;;  %v648_v41 = vadd.f32 %v552_v7, %v3773_v50  ;;  %v654_v5 = vadd.f32 %v558_v43, %v3809_v27  ;;  %v555_v27 = vld [vmem:[%s5383_s2 + $0x190] sm:$0xff] }
  0xff   :  { %v3823_v57 = vpop.xlane.xlu0 %380  ;;  %v2561_v47 = vpop.eup %2560  ;;  %2580 = vrcp.f32 %v1020_v10  ;;  %v1017_v31 = vadd.f32 1.0, %v2559_v0 }
 0x100   :  { %1602 = vperm.xlu0 %2432, %v2549_v38   ;;  %v2563_v63 = vpop.eup %2562  ;;  %2582 = vpow2.f32 %v2373_v23  ;;  %v2382_v20 = vmul.f32 -1.442695, %v648_v41  ;;  %v1019_v44 = vadd.f32 1.0, %v2561_v47 }
 0x101   :  { %v2565_v46 = vpop.eup %2564  ;;  %2584 = vrcp.f32 %v1015_v30  ;;  %v1024_v39 = vadd.f32 1.0, %v2563_v63  ;;  %v2383_v63 = vmul.f32 -1.442695, %v649_v1 }
 0x102   :  { %v3830_v28 = vpop.xlane.xlu1 %389  ;;  %1557 = vperm.xlu1 %2433, %v2535_v49   ;;  %v2567_v3 = vpop.eup %2566  ;;  %2586 = vpow2.f32 %v2380_v61  ;;  %v650_v49 = vadd.f32 %v554_v59, %v3786_v51  ;;  %v551_v51 = vld [vmem:[%s5383_s2 + $0x170] sm:$0xff]  ;;  %v2388_v61 = vmul.f32 -1.442695, %v654_v5 }
 0x103   :  { %v3832_v11 = vpop.xlane.xlu0 %386  ;;  %v2569_v12 = vpop.eup %2568  ;;  %2588 = vrcp.f32 %v1022_v40  ;;  %v647_v45 = vadd.f32 %v551_v51, %v3775_v13  ;;  %v562_v40 = vld [vmem:[%s5383_s2 + $0x1c8] sm:$0xff] }
 0x104   :  { %1612 = vperm.xlu0 %2432, %v2557_v24   ;;  %v2571_v56 = vpop.eup %2570  ;;  %2590 = vpow2.f32 %v2375_v48  ;;  %v2384_v42 = vmul.f32 -1.442695, %v650_v49  ;;  %v1021_v16 = vadd.f32 1.0, %v2569_v12  ;;  %v651_v48 = vadd.f32 %v555_v27, %v3800_v33  ;;  %v559_v12 = vld [vmem:[%s5383_s2 + $0x1b0] sm:$0xff] }
 0x105   :  { %v2573_v52 = vpop.eup %2572  ;;  %2592 = vrcp.f32 %v1017_v31  ;;  %v2381_v7 = vmul.f32 -1.442695, %v647_v45  ;;  %v653_v31 = vadd.f32 %v557_v37, %v3811_v36  ;;  %v658_v49 = vadd.f32 %v562_v40, %v3830_v28  ;;  %v564_v36 = vld [vmem:[%s5383_s2 + $0x1d8] sm:$0xff]  ;;  %v561_v45 = vld [vmem:[%s5383_s2 + $0x1c0] sm:$0xff]  ;;  %v570_v37 = vld [vmem:[%s5383_s2 + $0x208] sm:$0xff] }
 0x106   :  { %v3842_v60 = vpop.xlane.xlu1 %395  ;;  %1567 = vperm.xlu1 %2433, %v2545_v53   ;;  %v2575_v19 = vpop.eup %2574  ;;  %2594 = vpow2.f32 %v2382_v20  ;;  %v1026_v53 = vadd.f32 1.0, %v2571_v56  ;;  %v2385_v56 = vmul.f32 -1.442695, %v651_v48  ;;  %v655_v28 = vadd.f32 %v559_v12, %v3823_v57 }
 0x107   :  { %v3844_v50 = vpop.xlane.xlu0 %392  ;;  %v2577_v29 = vpop.eup %2576  ;;  %2596 = vrcp.f32 %v1024_v39 }
 0x108   :  { %1622 = vperm.xlu0 %2432, %v2565_v46   ;;  %v2579_v6 = vpop.eup %2578  ;;  %2598 = vrcp.f32 %v1019_v44 }
 0x109   :  { %v2581_v26 = vpop.eup %2580  ;;  %2600 = vpow2.f32 %v2377_v14  ;;  %v1028_v13 = vadd.f32 1.0, %v2579_v6 }
 0x10a   :  { %v3857_v54 = vpop.xlane.xlu1 %401  ;;  %1577 = vperm.xlu1 %2433, %v2553_v35   ;;  %v2583_v2 = vpop.eup %2582  ;;  %2602 = vpow2.f32 %v2384_v42  ;;  %v560_v35 = vld [vmem:[%s5383_s2 + $0x1b8] sm:$0xff]  ;;  %v660_v42 = vadd.f32 %v564_v36, %v3842_v60 }
 0x10b   :  { %v3859_v15 = vpop.xlane.xlu0 %398  ;;  %v2585_v22 = vpop.eup %2584  ;;  %2604 = vrcp.f32 %v1026_v53  ;;  %v1023_v32 = vadd.f32 1.0, %v2583_v2  ;;  %v656_v25 = vadd.f32 %v560_v35, %v3821_v58  ;;  %v566_v53 = vld [vmem:[%s5383_s2 + $0x1e8] sm:$0xff] }
 0x10c   :  { %1632 = vperm.xlu0 %2432, %v2573_v52   ;;  %v2587_v10 = vpop.eup %2586  ;;  %2606 = vrcp.f32 %v1021_v16  ;;  %v2387_v52 = vmul.f32 -1.442695, %v653_v31  ;;  %v2389_v16 = vmul.f32 -1.442695, %v655_v28  ;;  %v2394_v21 = vmul.f32 -1.442695, %v660_v42 }
 0x10d   :  { %v2589_v23 = vpop.eup %2588  ;;  %2608 = vpow2.f32 %v2379_v18  ;;  %v1030_v47 = vadd.f32 1.0, %v2587_v10  ;;  %v2390_v17 = vmul.f32 -1.442695, %v656_v25  ;;  %v662_v2 = vadd.f32 %v566_v53, %v3857_v54  ;;  %v563_v54 = vld [vmem:[%s5383_s2 + $0x1d0] sm:$0xff]  ;;  %v565_v31 = vld [vmem:[%s5383_s2 + $0x1e0] sm:$0xff] }
 0x10e   :  { %v3869_v38 = vpop.xlane.xlu1 %407  ;;  %1587 = vperm.xlu1 %2433, %v2567_v3   ;;  %v2591_v0 = vpop.eup %2590  ;;  %2610 = vpow2.f32 %v2386_v9  ;;  %v657_v10 = vadd.f32 %v561_v45, %v3832_v11  ;;  %v659_v40 = vadd.f32 %v563_v54, %v3844_v50  ;;  %v567_v28 = vld [vmem:[%s5383_s2 + $0x1f0] sm:$0xff] }
 0x10f   :  { %v3871_v4 = vpop.xlane.xlu0 %404  ;;  %v2593_v41 = vpop.eup %2592  ;;  %2612 = vrcp.f32 %v1028_v13  ;;  %v1025_v58 = vadd.f32 1.0, %v2591_v0  ;;  %v2396_v0 = vmul.f32 -1.442695, %v662_v2 }
 0x110   :  { %1642 = vperm.xlu0 %2432, %v2581_v26   ;;  %v2595_v59 = vpop.eup %2594  ;;  %2614 = vpow2.f32 %v2381_v7 }
 0x111   :  { %v2597_v46 = vpop.eup %2596  ;;  %2616 = vrcp.f32 %v1023_v32  ;;  %v1032_v39 = vadd.f32 1.0, %v2595_v59 }
 0x112   :  { %v3881_v24 = vpop.xlane.xlu1 %413  ;;  %1597 = vperm.xlu1 %2433, %v2575_v19   ;;  %v2599_v20 = vpop.eup %2598  ;;  %2618 = vpow2.f32 %v2388_v61  ;;  %v2392_v19 = vmul.f32 -1.442695, %v658_v49  ;;  %v572_v49 = vld [vmem:[%s5383_s2 + $0x218] sm:$0xff] }
 0x113   :  { %v3883_v30 = vpop.xlane.xlu0 %410  ;;  %v2601_v33 = vpop.eup %2600  ;;  %2620 = vrcp.f32 %v1030_v47  ;;  %v2391_v47 = vmul.f32 -1.442695, %v657_v10 }
 0x114   :  { %1652 = vperm.xlu0 %2432, %v2589_v23   ;;  %v2603_v34 = vpop.eup %2602  ;;  %2622 = vpow2.f32 %v2383_v63  ;;  %v1027_v57 = vadd.f32 1.0, %v2601_v33  ;;  %v2393_v33 = vmul.f32 -1.442695, %v659_v40 }
 0x115   :  { %v2605_v44 = vpop.eup %2604  ;;  %2624 = vrcp.f32 %v1025_v58 }
 0x116   :  { %v3894_v55 = vpop.xlane.xlu1 %419  ;;  %1607 = vperm.xlu1 %2433, %v2577_v29   ;;  %v2607_v51 = vpop.eup %2606  ;;  %2626 = vpow2.f32 %v2390_v17  ;;  %v1034_v29 = vadd.f32 1.0, %v2603_v34  ;;  %v661_v34 = vadd.f32 %v565_v31, %v3859_v15  ;;  %v574_v15 = vld [vmem:[%s5383_s2 + $0x228] sm:$0xff] }
 0x117   :  { %v3896_v3 = vpop.xlane.xlu0 %416  ;;  %v2609_v8 = vpop.eup %2608  ;;  %2628 = vrcp.f32 %v1032_v39 }
 0x118   :  { %1662 = vperm.xlu0 %2432, %v2597_v46   ;;  %v2611_v43 = vpop.eup %2610  ;;  %2630 = vpow2.f32 %v2385_v56  ;;  %v1029_v35 = vadd.f32 1.0, %v2609_v8 }
 0x119   :  { %v2613_v6 = vpop.eup %2612  ;;  %2632 = vpow2.f32 %v2387_v52  ;;  %v1036_v5 = vadd.f32 1.0, %v2611_v43  ;;  %v2395_v43 = vmul.f32 -1.442695, %v661_v34  ;;  %v577_v34 = vld [vmem:[%s5383_s2 + $0x240] sm:$0xff] }
 0x11a   :  { %v3906_v14 = vpop.xlane.xlu1 %425  ;;  %1617 = vperm.xlu1 %2433, %v2585_v22   ;;  %v2615_v18 = vpop.eup %2614  ;;  %2634 = vpow2.f32 %v2392_v19  ;;  %v568_v22 = vld [vmem:[%s5383_s2 + $0x1f8] sm:$0xff] }
 0x11b   :  { %v3908_v62 = vpop.xlane.xlu0 %422  ;;  %v2617_v9 = vpop.eup %2616  ;;  %2636 = vrcp.f32 %v1034_v29  ;;  %v1031_v1 = vadd.f32 1.0, %v2615_v18  ;;  %v664_v61 = vadd.f32 %v568_v22, %v3869_v38 }
 0x11c   :  { %1672 = vperm.xlu0 %2432, %v2605_v44   ;;  %v2619_v13 = vpop.eup %2618  ;;  %2638 = vrcp.f32 %v1027_v57  ;;  %v663_v57 = vadd.f32 %v567_v28, %v3871_v4  ;;  %v576_v4 = vld [vmem:[%s5383_s2 + $0x238] sm:$0xff] }
 0x11d   :  { %v2621_v7 = vpop.eup %2620  ;;  %2640 = vpow2.f32 %v2389_v16  ;;  %v1038_v11 = vadd.f32 1.0, %v2619_v13  ;;  %v2398_v58 = vmul.f32 -1.442695, %v664_v61 }
 0x11e   :  { %v3917_v26 = vpop.xlane.xlu1 %431  ;;  %1627 = vperm.xlu1 %2433, %v2593_v41   ;;  %v2623_v27 = vpop.eup %2622  ;;  %2642 = vpow2.f32 %v2394_v21  ;;  %v670_v21 = vadd.f32 %v574_v15, %v3906_v14  ;;  %v2397_v10 = vmul.f32 -1.442695, %v663_v57  ;;  %v571_v14 = vld [vmem:[%s5383_s2 + $0x210] sm:$0xff] }
 0x11f   :  { %v3919_v60 = vpop.xlane.xlu0 %428  ;;  %v2625_v25 = vpop.eup %2624  ;;  %2644 = vrcp.f32 %v1036_v5  ;;  %v1033_v63 = vadd.f32 1.0, %v2623_v27 }
 0x120   :  { %1682 = vperm.xlu0 %2432, %v2613_v6   ;;  %v2627_v41 = vpop.eup %2626  ;;  %2646 = vrcp.f32 %v1029_v35  ;;  %v2404_v27 = vmul.f32 -1.442695, %v670_v21  ;;  %v579_v21 = vld [vmem:[%s5383_s2 + $0x250] sm:$0xff] }
 0x121   :  { %v2629_v59 = vpop.eup %2628  ;;  %2648 = vrcp.f32 %v1031_v1  ;;  %v1040_v50 = vadd.f32 1.0, %v2627_v41  ;;  %v667_v41 = vadd.f32 %v571_v14, %v3896_v3  ;;  %v575_v3 = vld [vmem:[%s5383_s2 + $0x230] sm:$0xff] }
 0x122   :  { %v3929_v23 = vpop.xlane.xlu1 %437  ;;  %1637 = vperm.xlu1 %2433, %v2599_v20   ;;  %v2631_v46 = vpop.eup %2630  ;;  %2650 = vpow2.f32 %v2396_v0  ;;  %v666_v20 = vadd.f32 %v570_v37, %v3881_v24  ;;  %v672_v0 = vadd.f32 %v576_v4, %v3917_v26  ;;  %v573_v26 = vld [vmem:[%s5383_s2 + $0x220] sm:$0xff] }
 0x123   :  { %v3931_v32 = vpop.xlane.xlu0 %434  ;;  %v2633_v17 = vpop.eup %2632  ;;  %2652 = vrcp.f32 %v1038_v11  ;;  %v1035_v36 = vadd.f32 1.0, %v2631_v46 }
 0x124   :  { %1692 = vperm.xlu0 %2432, %v2621_v7   ;;  %v2635_v12 = vpop.eup %2634  ;;  %2654 = vpow2.f32 %v2391_v47  ;;  %v2400_v52 = vmul.f32 -1.442695, %v666_v20  ;;  %v1037_v29 = vadd.f32 1.0, %v2633_v17 }
 0x125   :  { %v2637_v39 = vpop.eup %2636  ;;  %2656 = vrcp.f32 %v1033_v63  ;;  %v1042_v42 = vadd.f32 1.0, %v2635_v12  ;;  %v2401_v12 = vmul.f32 -1.442695, %v667_v41  ;;  %v581_v41 = vld [vmem:[%s5383_s2 + $0x260] sm:$0xff] }
 0x126   :  { %v3938_v48 = vpop.xlane.xlu1 %443  ;;  %1647 = vperm.xlu1 %2433, %v2607_v51   ;;  %v2639_v44 = vpop.eup %2638  ;;  %2658 = vpow2.f32 %v2398_v58  ;;  %v668_v51 = vadd.f32 %v572_v49, %v3894_v55  ;;  %v569_v55 = vld [vmem:[%s5383_s2 + $0x200] sm:$0xff]  ;;  %v2406_v58 = vmul.f32 -1.442695, %v672_v0 }
 0x127   :  { %v3940_v38 = vpop.xlane.xlu0 %440  ;;  %v2641_v19 = vpop.eup %2640  ;;  %2660 = vrcp.f32 %v1040_v50  ;;  %v665_v13 = vadd.f32 %v569_v55, %v3883_v30  ;;  %v580_v50 = vld [vmem:[%s5383_s2 + $0x258] sm:$0xff] }
 0x128   :  { %1702 = vperm.xlu0 %2432, %v2629_v59   ;;  %v2643_v8 = vpop.eup %2642  ;;  %2662 = vpow2.f32 %v2393_v33  ;;  %v2402_v18 = vmul.f32 -1.442695, %v668_v51  ;;  %v1039_v22 = vadd.f32 1.0, %v2641_v19  ;;  %v669_v33 = vadd.f32 %v573_v26, %v3908_v62 }
 0x129   :  { %v2645_v53 = vpop.eup %2644  ;;  %2664 = vrcp.f32 %v1035_v36  ;;  %v2399_v37 = vmul.f32 -1.442695, %v665_v13  ;;  %v671_v36 = vadd.f32 %v575_v3, %v3919_v60  ;;  %v676_v19 = vadd.f32 %v580_v50, %v3938_v48  ;;  %v582_v60 = vld [vmem:[%s5383_s2 + $0x268] sm:$0xff]  ;;  %v588_v3 = vld [vmem:[%s5383_s2 + $0x298] sm:$0xff] }
 0x12a   :  { %v3950_v56 = vpop.xlane.xlu1 %449  ;;  %1657 = vperm.xlu1 %2433, %v2617_v9   ;;  %v2647_v45 = vpop.eup %2646  ;;  %2666 = vpow2.f32 %v2400_v52  ;;  %v1044_v9 = vadd.f32 1.0, %v2643_v8  ;;  %v2403_v8 = vmul.f32 -1.442695, %v669_v33 }
 0x12b   :  { %v3952_v24 = vpop.xlane.xlu0 %446  ;;  %v2649_v2 = vpop.eup %2648  ;;  %2668 = vrcp.f32 %v1042_v42 }
 0x12c   :  { %1712 = vperm.xlu0 %2432, %v2637_v39   ;;  %v2651_v5 = vpop.eup %2650  ;;  %2670 = vrcp.f32 %v1037_v29  ;;  %v673_v29 = vadd.f32 %v577_v34, %v3931_v32  ;;  %v677_v50 = vadd.f32 %v581_v41, %v3952_v24  ;;  %v590_v24 = vld [vmem:[%s5383_s2 + $0x2a8] sm:$0xff]  ;;  %v585_v41 = vld [vmem:[%s5383_s2 + $0x280] sm:$0xff] }
 0x12d   :  { %v2653_v35 = vpop.eup %2652  ;;  %2672 = vpow2.f32 %v2395_v43  ;;  %v1046_v30 = vadd.f32 1.0, %v2651_v5  ;;  %v2405_v43 = vmul.f32 -1.442695, %v671_v36 }
 0x12e   :  { %v3965_v6 = vpop.xlane.xlu1 %455  ;;  %1667 = vperm.xlu1 %2433, %v2625_v25   ;;  %v2655_v54 = vpop.eup %2654  ;;  %2674 = vpow2.f32 %v2402_v18  ;;  %v578_v25 = vld [vmem:[%s5383_s2 + $0x248] sm:$0xff]  ;;  %v678_v18 = vadd.f32 %v582_v60, %v3950_v56  ;;  %v2407_v5 = vmul.f32 -1.442695, %v673_v29  ;;  %v675_v56 = vadd.f32 %v579_v21, %v3940_v38  ;;  %v583_v60 = vld [vmem:[%s5383_s2 + $0x270] sm:$0xff] }
 0x12f   :  { %v3967_v16 = vpop.xlane.xlu0 %452  ;;  %v2657_v61 = vpop.eup %2656  ;;  %2676 = vrcp.f32 %v1044_v9  ;;  %v1041_v40 = vadd.f32 1.0, %v2655_v54  ;;  %v674_v31 = vadd.f32 %v578_v25, %v3929_v23  ;;  %v584_v9 = vld [vmem:[%s5383_s2 + $0x278] sm:$0xff] }
 0x130   :  { %1722 = vperm.xlu0 %2432, %v2645_v53   ;;  %v2659_v11 = vpop.eup %2658  ;;  %2678 = vrcp.f32 %v1039_v22  ;;  %v2412_v54 = vmul.f32 -1.442695, %v678_v18  ;;  %v1276_v18 = vld [vmem:[%s5384_s3 + $0x18] sm:$0xff] }
 0x131   :  { %v2661_v47 = vpop.eup %2660  ;;  %2680 = vpow2.f32 %v2397_v10  ;;  %v1048_v17 = vadd.f32 1.0, %v2659_v11  ;;  %v2408_v51 = vmul.f32 -1.442695, %v674_v31 }
 0x132   :  { %v3977_v7 = vpop.xlane.xlu1 %461  ;;  %1677 = vperm.xlu1 %2433, %v2639_v44   ;;  %v2663_v46 = vpop.eup %2662  ;;  %2682 = vpow2.f32 %v2404_v27  ;;  %v680_v27 = vadd.f32 %v584_v9, %v3965_v6 }
 0x133   :  { %v3979_v1 = vpop.xlane.xlu0 %458  ;;  %v2665_v20 = vpop.eup %2664  ;;  %2684 = vrcp.f32 %v1046_v30  ;;  %v1043_v23 = vadd.f32 1.0, %v2663_v46  ;;  %v586_v30 = vld [vmem:[%s5383_s2 + $0x288] sm:$0xff] }
 0x134   :  { %1732 = vperm.xlu0 %2432, %v2653_v35   ;;  %v2667_v49 = vpop.eup %2666  ;;  %2686 = vpow2.f32 %v2399_v37  ;;  %v2409_v37 = vmul.f32 -1.442695, %v675_v56  ;;  %v2414_v26 = vmul.f32 -1.442695, %v680_v27  ;;  %v682_v46 = vadd.f32 %v586_v30, %v3977_v7  ;;  %v1273_v30 = vld [vmem:[%s5384_s3] sm:$0xff] }
 0x135   :  { %v2669_v39 = vpop.eup %2668  ;;  %2688 = vrcp.f32 %v1041_v40  ;;  %v1050_v42 = vadd.f32 1.0, %v2667_v49 }
 0x136   :  { %v3989_v59 = vpop.xlane.xlu1 %467  ;;  %1687 = vperm.xlu1 %2433, %v2647_v45   ;;  %v2671_v28 = vpop.eup %2670  ;;  %2690 = vpow2.f32 %v2406_v58  ;;  %v2410_v45 = vmul.f32 -1.442695, %v676_v19  ;;  %v2411_v19 = vmul.f32 -1.442695, %v677_v50 }
 0x137   :  { %v3991_v63 = vpop.xlane.xlu0 %464  ;;  %v2673_v62 = vpop.eup %2672  ;;  %2692 = vrcp.f32 %v1048_v17  ;;  %v684_v36 = vadd.f32 %v588_v3, %v3989_v59  ;;  %v596_v3 = vld [vmem:[%s5383_s2 + $0x2d8] sm:$0xff] }
 0x138   :  { %1742 = vperm.xlu0 %2432, %v2661_v47   ;;  %v2675_v15 = vpop.eup %2674  ;;  %2694 = vpow2.f32 %v2401_v12  ;;  %v1045_v13 = vadd.f32 1.0, %v2673_v62 }
 0x139   :  { %v2677_v53 = vpop.eup %2676  ;;  %2696 = vrcp.f32 %v1043_v23  ;;  %v1052_v32 = vadd.f32 1.0, %v2675_v15  ;;  %v2416_v23 = vmul.f32 -1.442695, %v682_v46 }
 0x13a   :  { %v4005_v44 = vpop.xlane.xlu1 %473  ;;  %1697 = vperm.xlu1 %2433, %v2649_v2   ;;  %v2679_v55 = vpop.eup %2678  ;;  %2698 = vpow2.f32 %v2408_v51 }
 0x13b   :  { %v4007_v52 = vpop.xlane.xlu0 %470  ;;  %v2681_v2 = vpop.eup %2680  ;;  %2700 = vrcp.f32 %v1050_v42  ;;  %v686_v29 = vadd.f32 %v590_v24, %v4005_v44 }
 0x13c   :  { %1752 = vperm.xlu0 %2432, %v2669_v39   ;;  %v2683_v4 = vpop.eup %2682  ;;  %2702 = vpow2.f32 %v2403_v8  ;;  %v1047_v38 = vadd.f32 1.0, %v2681_v2  ;;  %v2418_v8 = vmul.f32 -1.442695, %v684_v36 }
 0x13d   :  { %v2685_v22 = vpop.eup %2684  ;;  %2704 = vpow2.f32 %v2405_v43  ;;  %v2420_v56 = vmul.f32 -1.442695, %v686_v29  ;;  %v598_v29 = vld [vmem:[%s5383_s2 + $0x2e8] sm:$0xff] }
 0x13e   :  { %v4014_v57 = vpop.xlane.xlu1 %479  ;;  %1707 = vperm.xlu1 %2433, %v2657_v61   ;;  %v2687_v14 = vpop.eup %2686  ;;  %2706 = vpow2.f32 %v2410_v45  ;;  %v1054_v61 = vadd.f32 1.0, %v2683_v4  ;;  %v1275_v45 = vld [vmem:[%s5384_s3 + $0x10] sm:$0xff] }
 0x13f   :  { %v4016_v48 = vpop.xlane.xlu0 %476  ;;  %v2689_v0 = vpop.eup %2688  ;;  %2708 = vrcp.f32 %v1052_v32  ;;  %v1049_v17 = vadd.f32 1.0, %v2687_v14  ;;  %v679_v32 = vadd.f32 %v583_v60, %v3967_v16  ;;  %v594_v14 = vld [vmem:[%s5383_s2 + $0x2c8] sm:$0xff] }
 0x140   :  { %1762 = vperm.xlu0 %2432, %v2677_v53   ;;  %v2691_v25 = vpop.eup %2690  ;;  %2710 = vpow2.f32 %v2407_v5  ;;  %v592_v53 = vld [vmem:[%s5383_s2 + $0x2b8] sm:$0xff] }
 0x141   :  { %v2693_v11 = vpop.eup %2692  ;;  %2712 = vrcp.f32 %v1045_v13  ;;  %v1056_v31 = vadd.f32 1.0, %v2691_v25  ;;  %v688_v5 = vadd.f32 %v592_v53, %v4014_v57  ;;  %v1277_v57 = vld [vmem:[%s5384_s3 + $0x20] sm:$0xff] }
 0x142   :  { %v4026_v35 = vpop.xlane.xlu1 %485  ;;  %1717 = vperm.xlu1 %2433, %v2665_v20   ;;  %v2695_v40 = vpop.eup %2694  ;;  %2714 = vpow2.f32 %v2412_v54 }
 0x143   :  { %v4028_v10 = vpop.xlane.xlu0 %482  ;;  %v2697_v58 = vpop.eup %2696  ;;  %2716 = vrcp.f32 %v1054_v61  ;;  %v1051_v12 = vadd.f32 1.0, %v2695_v40  ;;  %v1278_v61 = vld [vmem:[%s5384_s3 + $0x28] sm:$0xff]  ;;  %v2422_v40 = vmul.f32 -1.442695, %v688_v5 }
 0x144   :  { %1772 = vperm.xlu0 %2432, %v2685_v22   ;;  %v2699_v20 = vpop.eup %2698  ;;  %2718 = vrcp.f32 %v1047_v38  ;;  %v2413_v38 = vmul.f32 -1.442695, %v679_v32 }
 0x145   :  { %v2701_v49 = vpop.eup %2700  ;;  %2720 = vpow2.f32 %v2409_v37 }
 0x146   :  { %v4037_v47 = vpop.xlane.xlu1 %491  ;;  %1727 = vperm.xlu1 %2433, %v2671_v28   ;;  %v2703_v39 = vpop.eup %2702  ;;  %2722 = vpow2.f32 %v2414_v26  ;;  %v1058_v28 = vadd.f32 1.0, %v2699_v20  ;;  %v690_v26 = vadd.f32 %v594_v14, %v4026_v35 }
 0x147   :  { %v4039_v6 = vpop.xlane.xlu0 %488  ;;  %v2705_v34 = vpop.eup %2704  ;;  %2724 = vrcp.f32 %v1056_v31  ;;  %v1053_v42 = vadd.f32 1.0, %v2703_v39 }
 0x148   :  { %1782 = vperm.xlu0 %2432, %v2693_v11   ;;  %v2707_v51 = vpop.eup %2706  ;;  %2726 = vrcp.f32 %v1049_v17  ;;  %v1055_v44 = vadd.f32 1.0, %v2705_v34 }
 0x149   :  { %v2709_v62 = vpop.eup %2708  ;;  %2728 = vrcp.f32 %v1051_v12 }
 0x14a   :  { %v4046_v33 = vpop.xlane.xlu1 %497  ;;  %1737 = vperm.xlu1 %2433, %v2679_v55   ;;  %v2711_v59 = vpop.eup %2710  ;;  %2730 = vpow2.f32 %v2416_v23  ;;  %v1060_v55 = vadd.f32 1.0, %v2707_v51  ;;  %v681_v51 = vadd.f32 %v585_v41, %v3979_v1  ;;  %v2424_v1 = vmul.f32 -1.442695, %v690_v26 }
 0x14b   :  { %v4048_v7 = vpop.xlane.xlu0 %494  ;;  %v2713_v43 = vpop.eup %2712  ;;  %2732 = vrcp.f32 %v1058_v28  ;;  %v1057_v4 = vadd.f32 1.0, %v2711_v59  ;;  %v694_v14 = vadd.f32 %v598_v29, %v4046_v33 }
 0x14c   :  { %1792 = vperm.xlu0 %2432, %v2701_v49   ;;  %v2715_v2 = vpop.eup %2714  ;;  %2734 = vpow2.f32 %v2411_v19 }
 0x14d   :  { %v2717_v9 = vpop.eup %2716  ;;  %2736 = vrcp.f32 %v1053_v42  ;;  %v1062_v16 = vadd.f32 1.0, %v2715_v2  ;;  %v692_v42 = vadd.f32 %v596_v3, %v4037_v47 }
 0x14e   :  { %v4057_v15 = vpop.xlane.xlu1 %503  ;;  %1747 = vperm.xlu1 %2433, %v2689_v0   ;;  %v2719_v13 = vpop.eup %2718  ;;  %2738 = vpow2.f32 %v2418_v8 }
 0x14f   :  { %v4069_v21 = vpop.xlane.xlu0 %500  ;;  %v2721_v0 = vpop.eup %2720  ;;  %2740 = vrcp.f32 %v1060_v55 }
 0x150   :  { %1802 = vperm.xlu0 %2432, %v2709_v62   ;;  %v2723_v25 = vpop.eup %2722  ;;  %2742 = vrcp.f32 %v1055_v44  ;;  %v1059_v24 = vadd.f32 1.0, %v2721_v0  ;;  %v587_v62 = vld [vmem:[%s5383_s2 + $0x290] sm:$0xff] }
 0x151   :  { %v2725_v37 = vpop.eup %2724  ;;  %2744 = vrcp.f32 %v1057_v4  ;;  %v1064_v35 = vadd.f32 1.0, %v2723_v25  ;;  %v2415_v4 = vmul.f32 -1.442695, %v681_v51  ;;  %v683_v5 = vadd.f32 %v587_v62, %v3991_v63 }
 0x152   :  { %v1473_v22 = vpop.permute.xlu1 %1472  ;;  %1757 = vperm.xlu1 %2433, %v2697_v58   ;;  %v2727_v31 = vpop.eup %2726  ;;  %2746 = vpow2.f32 %v2420_v56  ;;  %v589_v56 = vld [vmem:[%s5383_s2 + $0x2a0] sm:$0xff] }
 0x153   :  { %v1947_v54 = vmul.f32 %v1473_v22, %v1275_v45  ;;  %v1948_v27 = vmul.f32 %v1473_v22, %v1276_v18  ;;  %v4105_v12 = vpop.eup %2728  ;;  %2748 = vrcp.f32 %v1062_v16  ;;  %v2426_v16 = vmul.f32 -1.442695, %v692_v42 }
 0x154   :  { %1812 = vperm.xlu0 %2432, %v2717_v9   ;;  %v2731_v28 = vpop.eup %2730  ;;  %2750 = vpow2.f32 %v2413_v38 }
 0x155   :  { %2140 = vst [vmem:[%s5385_s4 + $0x10] sm:$0xff] %v1947_v54  ;;  %2141 = vst.msk [vmem:[%s5385_s4 + $0x18] sm:$0xff] %vm2138_vm1, %v1948_v27  ;;  %v2733_v19 = vpop.eup %2732  ;;  %2752 = vpow2.f32 %v2422_v40  ;;  %v1066_v47 = vadd.f32 1.0, %v2731_v28 }
 0x156   :  { %v1478_v46 = vpop.permute.xlu1 %1477  ;;  %1767 = vperm.xlu1 %2433, %v2713_v43   ;;  %v2735_v8 = vpop.eup %2734  ;;  %2754 = vrcp.f32 %v1064_v35 }
 0x157   :  { %v1468_v58 = vpop.permute.xlu0 %1467  ;;  %v1949_v20 = vmul.f32 %v1478_v46, %v1277_v57  ;;  %v1950_v17 = vmul.f32 %v1478_v46, %v1278_v61  ;;  %v4138_v18 = vpop.eup %2736  ;;  %2756 = vrcp.f32 %v1059_v24  ;;  %v600_v57 = vld [vmem:[%s5383_s2 + $0x2f8] sm:$0xff]  ;;  %v2417_v46 = vmul.f32 -1.442695, %v683_v5 }
 0x158   :  { %v1945_v50 = vmul.f32 %v1468_v58, %v1273_v30  ;;  %1822 = vperm.xlu0 %2432, %v2725_v37   ;;  %v2739_v9 = vpop.eup %2738  ;;  %2758 = vpow2.f32 %v2424_v1 }
 0x159   :  { %v2741_v22 = vpop.eup %2740  ;;  %2760 = vrcp.f32 %v1066_v47 }
 0x15a   :  { %v1483_v60 = vpop.permute.xlu1 %1482  ;;  %1777 = vperm.xlu1 %2433, %v2719_v13   ;;  %v1061_v13 = vadd.f32 1.0, %v2735_v8  ;;  %v4171_v0 = vpop.eup %2742  ;;  %2762 = vpow2.f32 %v2415_v4 }
 0x15b   :  { %v1513_v59 = vpop.permute.xlu0 %1512  ;;  %v4176_v38 = vpop.eup %2744 }
 0x15c   :  { %v1274_v11 = vld [vmem:[%s5384_s3 + $0x8] sm:$0xff]  ;;  %v1279_v49 = vld [vmem:[%s5384_s3 + $0x30] sm:$0xff]  ;;  %v1280_v23 = vld [vmem:[%s5384_s3 + $0x38] sm:$0xff]  ;;  %1832 = vperm.xlu0 %2432, %v2733_v19   ;;  %v2747_v26 = vpop.eup %2746  ;;  %2764 = vrcp.f32 %v1061_v13 }
 0x15d   :  { %v1946_v39 = vmul.f32 %v1468_v58, %v1274_v11  ;;  %v1291_v36 = vld [vmem:[%s5384_s3 + $0x90] sm:$0xff]  ;;  %v1292_v34 = vld [vmem:[%s5384_s3 + $0x98] sm:$0xff]  ;;  %v1951_v53 = vmul.f32 %v1483_v60, %v1279_v49  ;;  %v1952_v43 = vmul.f32 %v1483_v60, %v1280_v23  ;;  %v1068_v11 = vadd.f32 1.0, %v2739_v9  ;;  %v2749_v3 = vpop.eup %2748  ;;  %v593_v60 = vld [vmem:[%s5383_s2 + $0x2c0] sm:$0xff] }
 0x15e   :  { %2142 = vst [vmem:[%s5385_s4 + $0x20] sm:$0xff] %v1949_v20  ;;  %2143 = vst.msk [vmem:[%s5385_s4 + $0x28] sm:$0xff] %vm2138_vm1, %v1950_v17  ;;  %v1963_v55 = vmul.f32 %v1513_v59, %v1291_v36  ;;  %v1964_v45 = vmul.f32 %v1513_v59, %v1292_v34  ;;  %v1488_v54 = vpop.permute.xlu1 %1487  ;;  %1787 = vperm.xlu1 %2433, %v2727_v31   ;;  %v685_v58 = vadd.f32 %v589_v56, %v4007_v52  ;;  %v591_v52 = vld [vmem:[%s5383_s2 + $0x2b0] sm:$0xff]  ;;  %v2751_v35 = vpop.eup %2750 }
 0x15f   :  { %2137 = vst [vmem:[%s5385_s4] sm:$0xff] %v1945_v50  ;;  %2139 = vst.msk [vmem:[%s5385_s4 + $0x8] sm:$0xff] %vm2138_vm1, %v1946_v39  ;;  %v1523_v27 = vpop.permute.xlu0 %1522  ;;  %v2428_v20 = vmul.f32 -1.442695, %v694_v14  ;;  %v696_v17 = vadd.f32 %v600_v57, %v4057_v15  ;;  %2766 = vpow2.f32 %v2426_v16  ;;  %v2753_v15 = vpop.eup %2752  ;;  %v1070_v28 = vadd.f32 1.0, %v2747_v26 }
 0x160   :  { %1842 = vperm.xlu0 %2432, %v2741_v22   ;;  %2768 = vrcp.f32 %v1068_v11  ;;  %v2419_v62 = vmul.f32 -1.442695, %v685_v58  ;;  %v687_v1 = vadd.f32 %v591_v52, %v4016_v48  ;;  %v2755_v42 = vpop.eup %2754  ;;  %v689_v5 = vadd.f32 %v593_v60, %v4028_v10  ;;  %v595_v22 = vld [vmem:[%s5383_s2 + $0x2d0] sm:$0xff] }
 0x161   :  { %2770 = vpow2.f32 %v2417_v46  ;;  %v2430_v48 = vmul.f32 -1.442695, %v696_v17  ;;  %v4241_v29 = vpop.eup %2756  ;;  %v1063_v10 = vadd.f32 1.0, %v2751_v35  ;;  %v597_v46 = vld [vmem:[%s5383_s2 + $0x2e0] sm:$0xff] }
 0x162   :  { %v1493_v50 = vpop.permute.xlu1 %1492  ;;  %1797 = vperm.xlu1 %2433, %v4105_v12   ;;  %2772 = vpow2.f32 %v2428_v20  ;;  %v2421_v4 = vmul.f32 -1.442695, %v687_v1 }
 0x163   :  { %v1533_v49 = vpop.permute.xlu0 %1532  ;;  %2774 = vrcp.f32 %v1070_v28 }
 0x164   :  { %1852 = vperm.xlu0 %2432, %v2749_v3   ;;  %2776 = vpow2.f32 %v2419_v62 }
 0x165   :  { %2778 = vpow2.f32 %v2430_v48 }
 0x166   :  { %v1281_v2 = vld [vmem:[%s5384_s3 + $0x40] sm:$0xff]  ;;  %v1282_v44 = vld [vmem:[%s5384_s3 + $0x48] sm:$0xff]  ;;  %v1295_v32 = vld [vmem:[%s5384_s3 + $0xb0] sm:$0xff]  ;;  %v1498_v59 = vpop.permute.xlu1 %1497  ;;  %1807 = vperm.xlu1 %2433, %v4138_v18  }
 0x167   :  { %2144 = vst [vmem:[%s5385_s4 + $0x30] sm:$0xff] %v1951_v53  ;;  %2145 = vst.msk [vmem:[%s5385_s4 + $0x38] sm:$0xff] %vm2138_vm1, %v1952_v43  ;;  %v1953_v61 = vmul.f32 %v1488_v54, %v1281_v2  ;;  %v1954_v30 = vmul.f32 %v1488_v54, %v1282_v44  ;;  %v1967_v25 = vmul.f32 %v1523_v27, %v1295_v32  ;;  %v1543_v8 = vpop.permute.xlu0 %1542  ;;  %v2759_v2 = vpop.eup %2758  ;;  %v1072_v44 = vadd.f32 1.0, %v2753_v15 }
 0x168   :  { %2156 = vst [vmem:[%s5385_s4 + $0x90] sm:$0xff] %v1963_v55  ;;  %2157 = vst.msk [vmem:[%s5385_s4 + $0x98] sm:$0xff] %vm2138_vm1, %v1964_v45  ;;  %1862 = vperm.xlu0 %2432, %v2755_v42   ;;  %v693_v15 = vadd.f32 %v597_v46, %v4048_v7 }
 0x169   :  { %2780 = vrcp.f32 %v1072_v44 }
 0x16a   :  { %v1503_v13 = vpop.permute.xlu1 %1502  ;;  %1817 = vperm.xlu1 %2433, %v4171_v0   ;;  %2782 = vpow2.f32 %v2421_v4 }
 0x16b   :  { %v1553_v56 = vpop.permute.xlu0 %1552  ;;  %2784 = vrcp.f32 %v1063_v10 }
 0x16e   :  { %v1508_v58 = vpop.permute.xlu1 %1507  ;;  %1827 = vperm.xlu1 %2433, %v4176_v38  }
 0x16f   :  { %v1296_v63 = vld [vmem:[%s5384_s3 + $0xb8] sm:$0xff]  ;;  %v1283_v33 = vld [vmem:[%s5384_s3 + $0x50] sm:$0xff] }
 0x170   :  { %v1968_v37 = vmul.f32 %v1523_v27, %v1296_v63  ;;  %v1284_v41 = vld [vmem:[%s5384_s3 + $0x58] sm:$0xff]  ;;  %v1299_v40 = vld [vmem:[%s5384_s3 + $0xd0] sm:$0xff]  ;;  %v1955_v39 = vmul.f32 %v1493_v50, %v1283_v33  ;;  %v2761_v63 = vpop.eup %2760 }
 0x171   :  { %2146 = vst [vmem:[%s5385_s4 + $0x40] sm:$0xff] %v1953_v61  ;;  %2147 = vst.msk [vmem:[%s5385_s4 + $0x48] sm:$0xff] %vm2138_vm1, %v1954_v30  ;;  %v1956_v23 = vmul.f32 %v1493_v50, %v1284_v41  ;;  %v1971_v36 = vmul.f32 %v1533_v49, %v1299_v40  ;;  %v2763_v14 = vpop.eup %2762  ;;  %1872 = vperm.xlu0 %2432, %v2761_v63   ;;  %v2423_v41 = vmul.f32 -1.442695, %v689_v5 }
 0x172   :  { %2160 = vst [vmem:[%s5385_s4 + $0xb0] sm:$0xff] %v1967_v25  ;;  %v4277_v30 = vpop.eup %2764  ;;  %v1074_v25 = vadd.f32 1.0, %v2759_v2  ;;  %v691_v40 = vadd.f32 %v595_v22, %v4039_v6  ;;  %v1065_v6 = vadd.f32 1.0, %v2763_v14  ;;  %1837 = vperm.xlu1 %2433, %v4241_v29  }
 0x173   :  { %v2767_v33 = vpop.eup %2766 }
 0x174   :  { %v2769_v26 = vpop.eup %2768  ;;  %2786 = vrcp.f32 %v1074_v25 }
 0x175   :  { %v2771_v3 = vpop.eup %2770  ;;  %1882 = vperm.xlu0 %2432, %v2769_v26   ;;  %2788 = vpow2.f32 %v2423_v41 }
 0x176   :  { %v2773_v35 = vpop.eup %2772  ;;  %2790 = vrcp.f32 %v1065_v6  ;;  %v1067_v7 = vadd.f32 1.0, %v2771_v3  ;;  %1847 = vperm.xlu1 %2433, %v4277_v30  }
 0x177   :  { %v2775_v28 = vpop.eup %2774 }
 0x179   :  { %v1300_v31 = vld [vmem:[%s5384_s3 + $0xd8] sm:$0xff]  ;;  %1892 = vperm.xlu0 %2432, %v2775_v28  }
 0x17a   :  { %2161 = vst.msk [vmem:[%s5385_s4 + $0xb8] sm:$0xff] %vm2138_vm1, %v1968_v37  ;;  %v1972_v24 = vmul.f32 %v1533_v49, %v1300_v31  ;;  %v1563_v31 = vpop.permute.xlu0 %1562 }
 0x181   :  { %v1285_v34 = vld [vmem:[%s5384_s3 + $0x60] sm:$0xff]  ;;  %v1286_v51 = vld [vmem:[%s5384_s3 + $0x68] sm:$0xff]  ;;  %v1303_v12 = vld [vmem:[%s5384_s3 + $0xf0] sm:$0xff] }
 0x182   :  { %v1304_v19 = vld [vmem:[%s5384_s3 + $0xf8] sm:$0xff]  ;;  %v1957_v53 = vmul.f32 %v1498_v59, %v1285_v34  ;;  %v1958_v43 = vmul.f32 %v1498_v59, %v1286_v51  ;;  %v1975_v55 = vmul.f32 %v1543_v8, %v1303_v12  ;;  %v2425_v34 = vmul.f32 -1.442695, %v691_v40  ;;  %v1518_v51 = vpop.permute.xlu1 %1517  ;;  %v1573_v12 = vpop.permute.xlu0 %1572 }
 0x183   :  { %2148 = vst [vmem:[%s5385_s4 + $0x50] sm:$0xff] %v1955_v39  ;;  %2149 = vst.msk [vmem:[%s5385_s4 + $0x58] sm:$0xff] %vm2138_vm1, %v1956_v23  ;;  %v1976_v45 = vmul.f32 %v1543_v8, %v1304_v19  ;;  %v1076_v39 = vadd.f32 1.0, %v2767_v33  ;;  %v2777_v19 = vpop.eup %2776  ;;  %v1078_v8 = vadd.f32 1.0, %v2773_v35 }
 0x184   :  { %2164 = vst [vmem:[%s5385_s4 + $0xd0] sm:$0xff] %v1971_v36  ;;  %2165 = vst.msk [vmem:[%s5385_s4 + $0xd8] sm:$0xff] %vm2138_vm1, %v1972_v24  ;;  %v599_v24 = vld [vmem:[%s5383_s2 + $0x2f0] sm:$0xff]  ;;  %v2779_v59 = vpop.eup %2778 }
 0x185   :  { %2792 = vrcp.f32 %v1076_v39  ;;  %v1080_v22 = vadd.f32 1.0, %v2779_v59 }
 0x186   :  { %2794 = vpow2.f32 %v2425_v34  ;;  %v1528_v2 = vpop.permute.xlu1 %1527  ;;  %v1583_v44 = vpop.permute.xlu0 %1582 }
 0x187   :  { %2796 = vrcp.f32 %v1067_v7 }
 0x188   :  { %2798 = vrcp.f32 %v1078_v8 }
 0x18b   :  { %v1287_v47 = vld [vmem:[%s5384_s3 + $0x70] sm:$0xff]  ;;  %v1288_v32 = vld [vmem:[%s5384_s3 + $0x78] sm:$0xff] }
 0x18c   :  { %v1307_v18 = vld [vmem:[%s5384_s3 + $0x110] sm:$0xff]  ;;  %v1308_v9 = vld [vmem:[%s5384_s3 + $0x118] sm:$0xff]  ;;  %v1959_v54 = vmul.f32 %v1503_v13, %v1287_v47  ;;  %v1960_v27 = vmul.f32 %v1503_v13, %v1288_v32  ;;  %v2781_v47 = vpop.eup %2780 }
 0x18d   :  { %2150 = vst [vmem:[%s5385_s4 + $0x60] sm:$0xff] %v1957_v53  ;;  %2151 = vst.msk [vmem:[%s5385_s4 + $0x68] sm:$0xff] %vm2138_vm1, %v1958_v43  ;;  %v1979_v16 = vmul.f32 %v1553_v56, %v1307_v18  ;;  %v1980_v57 = vmul.f32 %v1553_v56, %v1308_v9  ;;  %v2783_v32 = vpop.eup %2782  ;;  %1902 = vperm.xlu0 %2432, %v2781_v47  }
 0x18e   :  { %2168 = vst [vmem:[%s5385_s4 + $0xf0] sm:$0xff] %v1975_v55  ;;  %2169 = vst.msk [vmem:[%s5385_s4 + $0xf8] sm:$0xff] %vm2138_vm1, %v1976_v45  ;;  %v2427_v55 = vmul.f32 -1.442695, %v693_v15  ;;  %v695_v45 = vadd.f32 %v599_v24, %v4069_v21  ;;  %v1069_v21 = vadd.f32 1.0, %v2777_v19  ;;  %v2785_v10 = vpop.eup %2784 }
 0x18f   :  { %1857 = vperm.xlu1 %2433, %v2785_v10  }
 0x190   :  { %2800 = vpow2.f32 %v2427_v55 }
 0x191   :  { %2802 = vrcp.f32 %v1069_v21 }
 0x192   :  { %2804 = vrcp.f32 %v1080_v22 }
 0x195   :  { %v1289_v61 = vld [vmem:[%s5384_s3 + $0x80] sm:$0xff]  ;;  %v1290_v11 = vld [vmem:[%s5384_s3 + $0x88] sm:$0xff]  ;;  %v1311_v0 = vld [vmem:[%s5384_s3 + $0x130] sm:$0xff] }
 0x196   :  { %v1312_v37 = vld [vmem:[%s5384_s3 + $0x138] sm:$0xff]  ;;  %v1961_v52 = vmul.f32 %v1508_v58, %v1289_v61  ;;  %v1962_v20 = vmul.f32 %v1508_v58, %v1290_v11  ;;  %v1983_v17 = vmul.f32 %v1563_v31, %v1311_v0  ;;  %v1593_v61 = vpop.permute.xlu0 %1592 }
 0x197   :  { %2152 = vst [vmem:[%s5385_s4 + $0x70] sm:$0xff] %v1959_v54  ;;  %2153 = vst.msk [vmem:[%s5385_s4 + $0x78] sm:$0xff] %vm2138_vm1, %v1960_v27  ;;  %v1984_v50 = vmul.f32 %v1563_v31, %v1312_v37  ;;  %v2429_v54 = vmul.f32 -1.442695, %v695_v45  ;;  %v2787_v27 = vpop.eup %2786 }
 0x198   :  { %2172 = vst [vmem:[%s5385_s4 + $0x110] sm:$0xff] %v1979_v16  ;;  %2173 = vst.msk [vmem:[%s5385_s4 + $0x118] sm:$0xff] %vm2138_vm1, %v1980_v57  ;;  %v1071_v16 = vadd.f32 1.0, %v2783_v32  ;;  %v1538_v57 = vpop.permute.xlu1 %1537  ;;  %v2789_v30 = vpop.eup %2788  ;;  %1912 = vperm.xlu0 %2432, %v2787_v27  }
 0x199   :  { %v2791_v41 = vpop.eup %2790  ;;  %2806 = vpow2.f32 %v2429_v54  ;;  %v1073_v58 = vadd.f32 1.0, %v2789_v30 }
 0x19a   :  { %v2793_v46 = vpop.eup %2792  ;;  %2808 = vrcp.f32 %v1071_v16  ;;  %1867 = vperm.xlu1 %2433, %v2791_v41   ;;  %v1603_v3 = vpop.permute.xlu0 %1602 }
 0x19b   :  { %2810 = vrcp.f32 %v1073_v58 }
 0x19c   :  { %v1548_v31 = vpop.permute.xlu1 %1547  ;;  %1922 = vperm.xlu0 %2432, %v2793_v46  }
 0x19e   :  { %v1613_v7 = vpop.permute.xlu0 %1612 }
 0x19f   :  { %v1293_v49 = vld [vmem:[%s5384_s3 + $0xa0] sm:$0xff]  ;;  %v1294_v23 = vld [vmem:[%s5384_s3 + $0xa8] sm:$0xff]  ;;  %v1315_v38 = vld [vmem:[%s5384_s3 + $0x150] sm:$0xff] }
 0x1a0   :  { %v1316_v36 = vld [vmem:[%s5384_s3 + $0x158] sm:$0xff]  ;;  %v1965_v62 = vmul.f32 %v1518_v51, %v1293_v49  ;;  %v1966_v1 = vmul.f32 %v1518_v51, %v1294_v23  ;;  %v1987_v42 = vmul.f32 %v1573_v12, %v1315_v38  ;;  %v1558_v28 = vpop.permute.xlu1 %1557 }
 0x1a1   :  { %2154 = vst [vmem:[%s5385_s4 + $0x80] sm:$0xff] %v1961_v52  ;;  %2155 = vst.msk [vmem:[%s5385_s4 + $0x88] sm:$0xff] %vm2138_vm1, %v1962_v20  ;;  %v1988_v60 = vmul.f32 %v1573_v12, %v1316_v36  ;;  %v2795_v52 = vpop.eup %2794 }
 0x1a2   :  { %2176 = vst [vmem:[%s5385_s4 + $0x130] sm:$0xff] %v1983_v17  ;;  %2177 = vst.msk [vmem:[%s5385_s4 + $0x138] sm:$0xff] %vm2138_vm1, %v1984_v50  ;;  %v2797_v39 = vpop.eup %2796  ;;  %v1075_v15 = vadd.f32 1.0, %v2795_v52 }
 0x1a3   :  { %v2799_v34 = vpop.eup %2798  ;;  %1877 = vperm.xlu1 %2433, %v2797_v39  }
 0x1a4   :  { %v2801_v24 = vpop.eup %2800  ;;  %1932 = vperm.xlu0 %2432, %v2799_v34   ;;  %2812 = vrcp.f32 %v1075_v15 }
 0x1a9   :  { %v1297_v48 = vld [vmem:[%s5384_s3 + $0xc0] sm:$0xff]  ;;  %v1298_v53 = vld [vmem:[%s5384_s3 + $0xc8] sm:$0xff]  ;;  %v1319_v29 = vld [vmem:[%s5384_s3 + $0x170] sm:$0xff] }
 0x1aa   :  { %v1320_v43 = vld [vmem:[%s5384_s3 + $0x178] sm:$0xff]  ;;  %v1969_v18 = vmul.f32 %v1528_v2, %v1297_v48  ;;  %v1970_v9 = vmul.f32 %v1528_v2, %v1298_v53  ;;  %v1991_v4 = vmul.f32 %v1583_v44, %v1319_v29  ;;  %v1077_v53 = vadd.f32 1.0, %v2801_v24  ;;  %v1568_v29 = vpop.permute.xlu1 %1567 }
 0x1ab   :  { %2158 = vst [vmem:[%s5385_s4 + $0xa0] sm:$0xff] %v1965_v62  ;;  %2159 = vst.msk [vmem:[%s5385_s4 + $0xa8] sm:$0xff] %vm2138_vm1, %v1966_v1  ;;  %v1992_v5 = vmul.f32 %v1583_v44, %v1320_v43  ;;  %v1623_v43 = vpop.permute.xlu0 %1622 }
 0x1ac   :  { %2180 = vst [vmem:[%s5385_s4 + $0x150] sm:$0xff] %v1987_v42  ;;  %2181 = vst.msk [vmem:[%s5385_s4 + $0x158] sm:$0xff] %vm2138_vm1, %v1988_v60  ;;  %v2803_v42 = vpop.eup %2802  ;;  %2814 = vrcp.f32 %v1077_v53 }
 0x1ad   :  { %v2805_v8 = vpop.eup %2804  ;;  %1887 = vperm.xlu1 %2433, %v2803_v42  }
 0x1ae   :  { %v2807_v55 = vpop.eup %2806  ;;  %1942 = vperm.xlu0 %2432, %v2805_v8  }
 0x1af   :  { %v2809_v32 = vpop.eup %2808  ;;  %v1633_v10 = vpop.permute.xlu0 %1632 }
 0x1b0   :  { %v2811_v27 = vpop.eup %2810 }
 0x1b1   :  { %1897 = vperm.xlu1 %2433, %v2809_v32  }
 0x1b3   :  { %v1301_v63 = vld [vmem:[%s5384_s3 + $0xe0] sm:$0xff]  ;;  %v1302_v13 = vld [vmem:[%s5384_s3 + $0xe8] sm:$0xff]  ;;  %v1323_v56 = vld [vmem:[%s5384_s3 + $0x190] sm:$0xff] }
 0x1b4   :  { %v1324_v14 = vld [vmem:[%s5384_s3 + $0x198] sm:$0xff]  ;;  %v1973_v25 = vmul.f32 %v1538_v57, %v1301_v63  ;;  %v1974_v11 = vmul.f32 %v1538_v57, %v1302_v13  ;;  %v1995_v0 = vmul.f32 %v1593_v61, %v1323_v56  ;;  %v1578_v63 = vpop.permute.xlu1 %1577 }
 0x1b5   :  { %2162 = vst [vmem:[%s5385_s4 + $0xc0] sm:$0xff] %v1969_v18  ;;  %2163 = vst.msk [vmem:[%s5385_s4 + $0xc8] sm:$0xff] %vm2138_vm1, %v1970_v9  ;;  %v1996_v37 = vmul.f32 %v1593_v61, %v1324_v14  ;;  %1907 = vperm.xlu1 %2433, %v2811_v27  }
 0x1b6   :  { %2184 = vst [vmem:[%s5385_s4 + $0x170] sm:$0xff] %v1991_v4  ;;  %2185 = vst.msk [vmem:[%s5385_s4 + $0x178] sm:$0xff] %vm2138_vm1, %v1992_v5  ;;  %v1079_v5 = vadd.f32 1.0, %v2807_v55 }
 0x1b8   :  { %2816 = vrcp.f32 %v1079_v5  ;;  %v1588_v30 = vpop.permute.xlu1 %1587 }
 0x1bc   :  { %v1598_v58 = vpop.permute.xlu1 %1597 }
 0x1bd   :  { %v1305_v33 = vld [vmem:[%s5384_s3 + $0x100] sm:$0xff]  ;;  %v1306_v40 = vld [vmem:[%s5384_s3 + $0x108] sm:$0xff]  ;;  %v1327_v26 = vld [vmem:[%s5384_s3 + $0x1b0] sm:$0xff] }
 0x1be   :  { %v1328_v6 = vld [vmem:[%s5384_s3 + $0x1b8] sm:$0xff]  ;;  %v1977_v20 = vmul.f32 %v1548_v31, %v1305_v33  ;;  %v1978_v17 = vmul.f32 %v1548_v31, %v1306_v40  ;;  %v1999_v50 = vmul.f32 %v1603_v3, %v1327_v26  ;;  %v2813_v40 = vpop.eup %2812 }
 0x1bf   :  { %2166 = vst [vmem:[%s5385_s4 + $0xe0] sm:$0xff] %v1973_v25  ;;  %2167 = vst.msk [vmem:[%s5385_s4 + $0xe8] sm:$0xff] %vm2138_vm1, %v1974_v11  ;;  %v2000_v49 = vmul.f32 %v1603_v3, %v1328_v6  ;;  %v1643_v25 = vpop.permute.xlu0 %1642  ;;  %1917 = vperm.xlu1 %2433, %v2813_v40  }
 0x1c0   :  { %2188 = vst [vmem:[%s5385_s4 + $0x190] sm:$0xff] %v1995_v0  ;;  %2189 = vst.msk [vmem:[%s5385_s4 + $0x198] sm:$0xff] %vm2138_vm1, %v1996_v37 }
 0x1c3   :  { %v1653_v31 = vpop.permute.xlu0 %1652 }
 0x1c7   :  { %v1309_v35 = vld [vmem:[%s5384_s3 + $0x120] sm:$0xff]  ;;  %v1310_v23 = vld [vmem:[%s5384_s3 + $0x128] sm:$0xff]  ;;  %v1331_v38 = vld [vmem:[%s5384_s3 + $0x1d0] sm:$0xff] }
 0x1c8   :  { %v1332_v36 = vld [vmem:[%s5384_s3 + $0x1d8] sm:$0xff]  ;;  %v1981_v51 = vmul.f32 %v1558_v28, %v1309_v35  ;;  %v1982_v12 = vmul.f32 %v1558_v28, %v1310_v23  ;;  %v2003_v19 = vmul.f32 %v1613_v7, %v1331_v38  ;;  %v1608_v38 = vpop.permute.xlu1 %1607 }
 0x1c9   :  { %2170 = vst [vmem:[%s5385_s4 + $0x100] sm:$0xff] %v1977_v20  ;;  %2171 = vst.msk [vmem:[%s5385_s4 + $0x108] sm:$0xff] %vm2138_vm1, %v1978_v17  ;;  %v2004_v62 = vmul.f32 %v1613_v7, %v1332_v36  ;;  %v1663_v36 = vpop.permute.xlu0 %1662 }
 0x1ca   :  { %2192 = vst [vmem:[%s5385_s4 + $0x1b0] sm:$0xff] %v1999_v50  ;;  %2193 = vst.msk [vmem:[%s5385_s4 + $0x1b8] sm:$0xff] %vm2138_vm1, %v2000_v49  ;;  %v2815_v49 = vpop.eup %2814 }
 0x1cb   :  { %1927 = vperm.xlu1 %2433, %v2815_v49  }
 0x1cd   :  { %v1673_v42 = vpop.permute.xlu0 %1672 }
 0x1d1   :  { %v1313_v1 = vld [vmem:[%s5384_s3 + $0x140] sm:$0xff]  ;;  %v1314_v60 = vld [vmem:[%s5384_s3 + $0x148] sm:$0xff]  ;;  %v1335_v48 = vld [vmem:[%s5384_s3 + $0x1f0] sm:$0xff] }
 0x1d2   :  { %v1336_v59 = vld [vmem:[%s5384_s3 + $0x1f8] sm:$0xff]  ;;  %v1985_v45 = vmul.f32 %v1568_v29, %v1313_v1  ;;  %v1986_v47 = vmul.f32 %v1568_v29, %v1314_v60  ;;  %v2007_v21 = vmul.f32 %v1623_v43, %v1335_v48  ;;  %v1618_v1 = vpop.permute.xlu1 %1617 }
 0x1d3   :  { %2174 = vst [vmem:[%s5385_s4 + $0x120] sm:$0xff] %v1981_v51  ;;  %2175 = vst.msk [vmem:[%s5385_s4 + $0x128] sm:$0xff] %vm2138_vm1, %v1982_v12  ;;  %v2008_v2 = vmul.f32 %v1623_v43, %v1336_v59  ;;  %v2817_v51 = vpop.eup %2816 }
 0x1d4   :  { %2196 = vst [vmem:[%s5385_s4 + $0x1d0] sm:$0xff] %v2003_v19  ;;  %2197 = vst.msk [vmem:[%s5385_s4 + $0x1d8] sm:$0xff] %vm2138_vm1, %v2004_v62  ;;  %1937 = vperm.xlu1 %2433, %v2817_v51  }
 0x1db   :  { %v1317_v44 = vld [vmem:[%s5384_s3 + $0x160] sm:$0xff]  ;;  %v1318_v18 = vld [vmem:[%s5384_s3 + $0x168] sm:$0xff]  ;;  %v1339_v9 = vld [vmem:[%s5384_s3 + $0x210] sm:$0xff] }
 0x1dc   :  { %v1340_v4 = vld [vmem:[%s5384_s3 + $0x218] sm:$0xff]  ;;  %v1989_v22 = vmul.f32 %v1578_v63, %v1317_v44  ;;  %v1990_v13 = vmul.f32 %v1578_v63, %v1318_v18  ;;  %v2011_v56 = vmul.f32 %v1633_v10, %v1339_v9 }
 0x1dd   :  { %2178 = vst [vmem:[%s5385_s4 + $0x140] sm:$0xff] %v1985_v45  ;;  %2179 = vst.msk [vmem:[%s5385_s4 + $0x148] sm:$0xff] %vm2138_vm1, %v1986_v47  ;;  %v2012_v14 = vmul.f32 %v1633_v10, %v1340_v4  ;;  %v1628_v45 = vpop.permute.xlu1 %1627  ;;  %v1683_v47 = vpop.permute.xlu0 %1682 }
 0x1de   :  { %2200 = vst [vmem:[%s5385_s4 + $0x1f0] sm:$0xff] %v2007_v21  ;;  %2201 = vst.msk [vmem:[%s5385_s4 + $0x1f8] sm:$0xff] %vm2138_vm1, %v2008_v2 }
 0x1e1   :  { %v1638_v63 = vpop.permute.xlu1 %1637  ;;  %v1693_v10 = vpop.permute.xlu0 %1692 }
 0x1e5   :  { %v1321_v54 = vld [vmem:[%s5384_s3 + $0x180] sm:$0xff]  ;;  %v1322_v16 = vld [vmem:[%s5384_s3 + $0x188] sm:$0xff]  ;;  %v1343_v57 = vld [vmem:[%s5384_s3 + $0x230] sm:$0xff] }
 0x1e6   :  { %v1344_v61 = vld [vmem:[%s5384_s3 + $0x238] sm:$0xff]  ;;  %v1993_v11 = vmul.f32 %v1588_v30, %v1321_v54  ;;  %v1994_v0 = vmul.f32 %v1588_v30, %v1322_v16  ;;  %v2015_v37 = vmul.f32 %v1643_v25, %v1343_v57  ;;  %v1703_v30 = vpop.permute.xlu0 %1702 }
 0x1e7   :  { %2182 = vst [vmem:[%s5385_s4 + $0x160] sm:$0xff] %v1989_v22  ;;  %2183 = vst.msk [vmem:[%s5385_s4 + $0x168] sm:$0xff] %vm2138_vm1, %v1990_v13  ;;  %v2016_v33 = vmul.f32 %v1643_v25, %v1344_v61  ;;  %v1648_v61 = vpop.permute.xlu1 %1647 }
 0x1e8   :  { %2204 = vst [vmem:[%s5385_s4 + $0x210] sm:$0xff] %v2011_v56  ;;  %2205 = vst.msk [vmem:[%s5385_s4 + $0x218] sm:$0xff] %vm2138_vm1, %v2012_v14 }
 0x1ef   :  { %v1325_v41 = vld [vmem:[%s5384_s3 + $0x1a0] sm:$0xff]  ;;  %v1326_v26 = vld [vmem:[%s5384_s3 + $0x1a8] sm:$0xff]  ;;  %v1347_v6 = vld [vmem:[%s5384_s3 + $0x250] sm:$0xff] }
 0x1f0   :  { %v1348_v46 = vld [vmem:[%s5384_s3 + $0x258] sm:$0xff]  ;;  %v1997_v3 = vmul.f32 %v1598_v58, %v1325_v41  ;;  %v1998_v52 = vmul.f32 %v1598_v58, %v1326_v26  ;;  %v2019_v20 = vmul.f32 %v1653_v31, %v1347_v6  ;;  %v1658_v6 = vpop.permute.xlu1 %1657 }
 0x1f1   :  { %2186 = vst [vmem:[%s5385_s4 + $0x180] sm:$0xff] %v1993_v11  ;;  %2187 = vst.msk [vmem:[%s5385_s4 + $0x188] sm:$0xff] %vm2138_vm1, %v1994_v0  ;;  %v2020_v17 = vmul.f32 %v1653_v31, %v1348_v46  ;;  %v1713_v46 = vpop.permute.xlu0 %1712 }
 0x1f2   :  { %2208 = vst [vmem:[%s5385_s4 + $0x230] sm:$0xff] %v2015_v37  ;;  %2209 = vst.msk [vmem:[%s5385_s4 + $0x238] sm:$0xff] %vm2138_vm1, %v2016_v33 }
 0x1f9   :  { %v1329_v50 = vld [vmem:[%s5384_s3 + $0x1c0] sm:$0xff]  ;;  %v1330_v35 = vld [vmem:[%s5384_s3 + $0x1c8] sm:$0xff]  ;;  %v1351_v39 = vld [vmem:[%s5384_s3 + $0x270] sm:$0xff] }
 0x1fa   :  { %v1352_v23 = vld [vmem:[%s5384_s3 + $0x278] sm:$0xff]  ;;  %v2001_v34 = vmul.f32 %v1608_v38, %v1329_v50  ;;  %v2002_v15 = vmul.f32 %v1608_v38, %v1330_v35  ;;  %v2023_v28 = vmul.f32 %v1663_v36, %v1351_v39  ;;  %v1668_v35 = vpop.permute.xlu1 %1667  ;;  %v1723_v39 = vpop.permute.xlu0 %1722 }
 0x1fb   :  { %2190 = vst [vmem:[%s5385_s4 + $0x1a0] sm:$0xff] %v1997_v3  ;;  %2191 = vst.msk [vmem:[%s5385_s4 + $0x1a8] sm:$0xff] %vm2138_vm1, %v1998_v52  ;;  %v2024_v7 = vmul.f32 %v1663_v36, %v1352_v23 }
 0x1fc   :  { %2212 = vst [vmem:[%s5385_s4 + $0x250] sm:$0xff] %v2019_v20  ;;  %2213 = vst.msk [vmem:[%s5385_s4 + $0x258] sm:$0xff] %vm2138_vm1, %v2020_v17 }
 0x1fe   :  { %v1678_v51 = vpop.permute.xlu1 %1677 }
 0x203   :  { %v1333_v24 = vld [vmem:[%s5384_s3 + $0x1e0] sm:$0xff]  ;;  %v1334_v12 = vld [vmem:[%s5384_s3 + $0x1e8] sm:$0xff]  ;;  %v1355_v19 = vld [vmem:[%s5384_s3 + $0x290] sm:$0xff] }
 0x204   :  { %v1356_v62 = vld [vmem:[%s5384_s3 + $0x298] sm:$0xff]  ;;  %v2005_v60 = vmul.f32 %v1618_v1, %v1333_v24  ;;  %v2006_v48 = vmul.f32 %v1618_v1, %v1334_v12  ;;  %v2027_v59 = vmul.f32 %v1673_v42, %v1355_v19  ;;  %v1733_v12 = vpop.permute.xlu0 %1732 }
 0x205   :  { %2194 = vst [vmem:[%s5385_s4 + $0x1c0] sm:$0xff] %v2001_v34  ;;  %2195 = vst.msk [vmem:[%s5385_s4 + $0x1c8] sm:$0xff] %vm2138_vm1, %v2002_v15  ;;  %v2028_v8 = vmul.f32 %v1673_v42, %v1356_v62 }
 0x206   :  { %2216 = vst [vmem:[%s5385_s4 + $0x270] sm:$0xff] %v2023_v28  ;;  %2217 = vst.msk [vmem:[%s5385_s4 + $0x278] sm:$0xff] %vm2138_vm1, %v2024_v7 }
 0x20d   :  { %v1337_v53 = vld [vmem:[%s5384_s3 + $0x200] sm:$0xff]  ;;  %v1338_v29 = vld [vmem:[%s5384_s3 + $0x208] sm:$0xff]  ;;  %v1359_v43 = vld [vmem:[%s5384_s3 + $0x2b0] sm:$0xff] }
 0x20e   :  { %v1360_v55 = vld [vmem:[%s5384_s3 + $0x2b8] sm:$0xff]  ;;  %v2009_v21 = vmul.f32 %v1628_v45, %v1337_v53  ;;  %v2010_v2 = vmul.f32 %v1628_v45, %v1338_v29  ;;  %v2031_v44 = vmul.f32 %v1683_v47, %v1359_v43  ;;  %v1688_v53 = vpop.permute.xlu1 %1687  ;;  %v1743_v29 = vpop.permute.xlu0 %1742 }
 0x20f   :  { %2198 = vst [vmem:[%s5385_s4 + $0x1e0] sm:$0xff] %v2005_v60  ;;  %2199 = vst.msk [vmem:[%s5385_s4 + $0x1e8] sm:$0xff] %vm2138_vm1, %v2006_v48  ;;  %v2032_v32 = vmul.f32 %v1683_v47, %v1360_v55 }
 0x210   :  { %2220 = vst [vmem:[%s5385_s4 + $0x290] sm:$0xff] %v2027_v59  ;;  %2221 = vst.msk [vmem:[%s5385_s4 + $0x298] sm:$0xff] %vm2138_vm1, %v2028_v8 }
 0x217   :  { %v1341_v18 = vld [vmem:[%s5384_s3 + $0x220] sm:$0xff]  ;;  %v1342_v9 = vld [vmem:[%s5384_s3 + $0x228] sm:$0xff]  ;;  %v1363_v4 = vld [vmem:[%s5384_s3 + $0x2d0] sm:$0xff] }
 0x218   :  { %v1364_v5 = vld [vmem:[%s5384_s3 + $0x2d8] sm:$0xff]  ;;  %v2013_v22 = vmul.f32 %v1638_v63, %v1341_v18  ;;  %v2014_v13 = vmul.f32 %v1638_v63, %v1342_v9  ;;  %v2035_v56 = vmul.f32 %v1693_v10, %v1363_v4  ;;  %v1698_v18 = vpop.permute.xlu1 %1697  ;;  %v1753_v9 = vpop.permute.xlu0 %1752 }
 0x219   :  { %2202 = vst [vmem:[%s5385_s4 + $0x200] sm:$0xff] %v2009_v21  ;;  %2203 = vst.msk [vmem:[%s5385_s4 + $0x208] sm:$0xff] %vm2138_vm1, %v2010_v2  ;;  %v2036_v14 = vmul.f32 %v1693_v10, %v1364_v5 }
 0x21a   :  { %2224 = vst [vmem:[%s5385_s4 + $0x2b0] sm:$0xff] %v2031_v44  ;;  %2225 = vst.msk [vmem:[%s5385_s4 + $0x2b8] sm:$0xff] %vm2138_vm1, %v2032_v32 }
 0x221   :  { %v1345_v54 = vld [vmem:[%s5384_s3 + $0x240] sm:$0xff]  ;;  %v1346_v27 = vld [vmem:[%s5384_s3 + $0x248] sm:$0xff]  ;;  %v1367_v16 = vld [vmem:[%s5384_s3 + $0x2f0] sm:$0xff] }
 0x222   :  { %v1368_v57 = vld [vmem:[%s5384_s3 + $0x2f8] sm:$0xff]  ;;  %v2017_v25 = vmul.f32 %v1648_v61, %v1345_v54  ;;  %v2018_v11 = vmul.f32 %v1648_v61, %v1346_v27  ;;  %v2039_v0 = vmul.f32 %v1703_v30, %v1367_v16  ;;  %v1708_v54 = vpop.permute.xlu1 %1707  ;;  %v1763_v27 = vpop.permute.xlu0 %1762 }
 0x223   :  { %2206 = vst [vmem:[%s5385_s4 + $0x220] sm:$0xff] %v2013_v22  ;;  %2207 = vst.msk [vmem:[%s5385_s4 + $0x228] sm:$0xff] %vm2138_vm1, %v2014_v13  ;;  %v2040_v37 = vmul.f32 %v1703_v30, %v1368_v57 }
 0x224   :  { %2228 = vst [vmem:[%s5385_s4 + $0x2d0] sm:$0xff] %v2035_v56  ;;  %2229 = vst.msk [vmem:[%s5385_s4 + $0x2d8] sm:$0xff] %vm2138_vm1, %v2036_v14 }
 0x22b   :  { %v1349_v33 = vld [vmem:[%s5384_s3 + $0x260] sm:$0xff]  ;;  %v1350_v41 = vld [vmem:[%s5384_s3 + $0x268] sm:$0xff]  ;;  %v1371_v40 = vld [vmem:[%s5384_s3 + $0x310] sm:$0xff] }
 0x22c   :  { %v1372_v26 = vld [vmem:[%s5384_s3 + $0x318] sm:$0xff]  ;;  %v2021_v58 = vmul.f32 %v1658_v6, %v1349_v33  ;;  %v2022_v31 = vmul.f32 %v1658_v6, %v1350_v41  ;;  %v2043_v3 = vmul.f32 %v1713_v46, %v1371_v40  ;;  %v1718_v33 = vpop.permute.xlu1 %1717  ;;  %v1773_v41 = vpop.permute.xlu0 %1772 }
 0x22d   :  { %2210 = vst [vmem:[%s5385_s4 + $0x240] sm:$0xff] %v2017_v25  ;;  %2211 = vst.msk [vmem:[%s5385_s4 + $0x248] sm:$0xff] %vm2138_vm1, %v2018_v11  ;;  %v2044_v52 = vmul.f32 %v1713_v46, %v1372_v26 }
 0x22e   :  { %2232 = vst [vmem:[%s5385_s4 + $0x2f0] sm:$0xff] %v2039_v0  ;;  %2233 = vst.msk [vmem:[%s5385_s4 + $0x2f8] sm:$0xff] %vm2138_vm1, %v2040_v37 }
 0x235   :  { %v1353_v20 = vld [vmem:[%s5384_s3 + $0x280] sm:$0xff]  ;;  %v1354_v17 = vld [vmem:[%s5384_s3 + $0x288] sm:$0xff]  ;;  %v1375_v50 = vld [vmem:[%s5384_s3 + $0x330] sm:$0xff] }
 0x236   :  { %v1376_v49 = vld [vmem:[%s5384_s3 + $0x338] sm:$0xff]  ;;  %v2025_v23 = vmul.f32 %v1668_v35, %v1353_v20  ;;  %v2026_v38 = vmul.f32 %v1668_v35, %v1354_v17  ;;  %v2047_v36 = vmul.f32 %v1723_v39, %v1375_v50  ;;  %v1728_v20 = vpop.permute.xlu1 %1727  ;;  %v1783_v17 = vpop.permute.xlu0 %1782 }
 0x237   :  { %2214 = vst [vmem:[%s5385_s4 + $0x260] sm:$0xff] %v2021_v58  ;;  %2215 = vst.msk [vmem:[%s5385_s4 + $0x268] sm:$0xff] %vm2138_vm1, %v2022_v31  ;;  %v2048_v34 = vmul.f32 %v1723_v39, %v1376_v49 }
 0x238   :  { %2236 = vst [vmem:[%s5385_s4 + $0x310] sm:$0xff] %v2043_v3  ;;  %2237 = vst.msk [vmem:[%s5385_s4 + $0x318] sm:$0xff] %vm2138_vm1, %v2044_v52 }
 0x23f   :  { %v1357_v15 = vld [vmem:[%s5384_s3 + $0x2a0] sm:$0xff]  ;;  %v1358_v28 = vld [vmem:[%s5384_s3 + $0x2a8] sm:$0xff]  ;;  %v1379_v7 = vld [vmem:[%s5384_s3 + $0x350] sm:$0xff] }
 0x240   :  { %v1380_v24 = vld [vmem:[%s5384_s3 + $0x358] sm:$0xff]  ;;  %v2029_v19 = vmul.f32 %v1678_v51, %v1357_v15  ;;  %v2030_v62 = vmul.f32 %v1678_v51, %v1358_v28  ;;  %v2051_v1 = vmul.f32 %v1733_v12, %v1379_v7  ;;  %v1738_v15 = vpop.permute.xlu1 %1737  ;;  %v1793_v28 = vpop.permute.xlu0 %1792 }
 0x241   :  { %2218 = vst [vmem:[%s5385_s4 + $0x280] sm:$0xff] %v2025_v23  ;;  %2219 = vst.msk [vmem:[%s5385_s4 + $0x288] sm:$0xff] %vm2138_vm1, %v2026_v38  ;;  %v2052_v42 = vmul.f32 %v1733_v12, %v1380_v24 }
 0x242   :  { %2240 = vst [vmem:[%s5385_s4 + $0x330] sm:$0xff] %v2047_v36  ;;  %2241 = vst.msk [vmem:[%s5385_s4 + $0x338] sm:$0xff] %vm2138_vm1, %v2048_v34 }
 0x249   :  { %v1361_v60 = vld [vmem:[%s5384_s3 + $0x2c0] sm:$0xff]  ;;  %v1362_v48 = vld [vmem:[%s5384_s3 + $0x2c8] sm:$0xff]  ;;  %v1383_v59 = vld [vmem:[%s5384_s3 + $0x370] sm:$0xff] }
 0x24a   :  { %v1384_v8 = vld [vmem:[%s5384_s3 + $0x378] sm:$0xff]  ;;  %v2033_v43 = vmul.f32 %v1688_v53, %v1361_v60  ;;  %v2034_v55 = vmul.f32 %v1688_v53, %v1362_v48  ;;  %v2055_v45 = vmul.f32 %v1743_v29, %v1383_v59  ;;  %v1748_v60 = vpop.permute.xlu1 %1747  ;;  %v1803_v48 = vpop.permute.xlu0 %1802 }
 0x24b   :  { %2222 = vst [vmem:[%s5385_s4 + $0x2a0] sm:$0xff] %v2029_v19  ;;  %2223 = vst.msk [vmem:[%s5385_s4 + $0x2a8] sm:$0xff] %vm2138_vm1, %v2030_v62  ;;  %v2056_v47 = vmul.f32 %v1743_v29, %v1384_v8 }
 0x24c   :  { %2244 = vst [vmem:[%s5385_s4 + $0x350] sm:$0xff] %v2051_v1  ;;  %2245 = vst.msk [vmem:[%s5385_s4 + $0x358] sm:$0xff] %vm2138_vm1, %v2052_v42 }
 0x253   :  { %v1365_v21 = vld [vmem:[%s5384_s3 + $0x2e0] sm:$0xff]  ;;  %v1366_v2 = vld [vmem:[%s5384_s3 + $0x2e8] sm:$0xff]  ;;  %v1387_v44 = vld [vmem:[%s5384_s3 + $0x390] sm:$0xff] }
 0x254   :  { %v1388_v32 = vld [vmem:[%s5384_s3 + $0x398] sm:$0xff]  ;;  %v2037_v4 = vmul.f32 %v1698_v18, %v1365_v21  ;;  %v2038_v5 = vmul.f32 %v1698_v18, %v1366_v2  ;;  %v2059_v63 = vmul.f32 %v1753_v9, %v1387_v44  ;;  %v1758_v21 = vpop.permute.xlu1 %1757  ;;  %v1813_v2 = vpop.permute.xlu0 %1812 }
 0x255   :  { %2226 = vst [vmem:[%s5385_s4 + $0x2c0] sm:$0xff] %v2033_v43  ;;  %2227 = vst.msk [vmem:[%s5385_s4 + $0x2c8] sm:$0xff] %vm2138_vm1, %v2034_v55  ;;  %v2060_v10 = vmul.f32 %v1753_v9, %v1388_v32 }
 0x256   :  { %2248 = vst [vmem:[%s5385_s4 + $0x370] sm:$0xff] %v2055_v45  ;;  %2249 = vst.msk [vmem:[%s5385_s4 + $0x378] sm:$0xff] %vm2138_vm1, %v2056_v47 }
 0x25d   :  { %v1369_v22 = vld [vmem:[%s5384_s3 + $0x300] sm:$0xff]  ;;  %v1370_v13 = vld [vmem:[%s5384_s3 + $0x308] sm:$0xff]  ;;  %v1391_v56 = vld [vmem:[%s5384_s3 + $0x3b0] sm:$0xff] }
 0x25e   :  { %v1392_v14 = vld [vmem:[%s5384_s3 + $0x3b8] sm:$0xff]  ;;  %v2041_v16 = vmul.f32 %v1708_v54, %v1369_v22  ;;  %v2042_v57 = vmul.f32 %v1708_v54, %v1370_v13  ;;  %v2063_v61 = vmul.f32 %v1763_v27, %v1391_v56  ;;  %v1768_v22 = vpop.permute.xlu1 %1767  ;;  %v1823_v13 = vpop.permute.xlu0 %1822 }
 0x25f   :  { %2230 = vst [vmem:[%s5385_s4 + $0x2e0] sm:$0xff] %v2037_v4  ;;  %2231 = vst.msk [vmem:[%s5385_s4 + $0x2e8] sm:$0xff] %vm2138_vm1, %v2038_v5  ;;  %v2064_v30 = vmul.f32 %v1763_v27, %v1392_v14 }
 0x260   :  { %2252 = vst [vmem:[%s5385_s4 + $0x390] sm:$0xff] %v2059_v63  ;;  %2253 = vst.msk [vmem:[%s5385_s4 + $0x398] sm:$0xff] %vm2138_vm1, %v2060_v10 }
 0x267   :  { %v1373_v25 = vld [vmem:[%s5384_s3 + $0x320] sm:$0xff]  ;;  %v1374_v11 = vld [vmem:[%s5384_s3 + $0x328] sm:$0xff]  ;;  %v1395_v0 = vld [vmem:[%s5384_s3 + $0x3d0] sm:$0xff] }
 0x268   :  { %v1396_v37 = vld [vmem:[%s5384_s3 + $0x3d8] sm:$0xff]  ;;  %v2045_v40 = vmul.f32 %v1718_v33, %v1373_v25  ;;  %v2046_v26 = vmul.f32 %v1718_v33, %v1374_v11  ;;  %v2067_v6 = vmul.f32 %v1773_v41, %v1395_v0  ;;  %v1778_v25 = vpop.permute.xlu1 %1777  ;;  %v1833_v11 = vpop.permute.xlu0 %1832 }
 0x269   :  { %2234 = vst [vmem:[%s5385_s4 + $0x300] sm:$0xff] %v2041_v16  ;;  %2235 = vst.msk [vmem:[%s5385_s4 + $0x308] sm:$0xff] %vm2138_vm1, %v2042_v57  ;;  %v2068_v46 = vmul.f32 %v1773_v41, %v1396_v37 }
 0x26a   :  { %2256 = vst [vmem:[%s5385_s4 + $0x3b0] sm:$0xff] %v2063_v61  ;;  %2257 = vst.msk [vmem:[%s5385_s4 + $0x3b8] sm:$0xff] %vm2138_vm1, %v2064_v30 }
 0x271   :  { %v1377_v58 = vld [vmem:[%s5384_s3 + $0x340] sm:$0xff]  ;;  %v1378_v31 = vld [vmem:[%s5384_s3 + $0x348] sm:$0xff]  ;;  %v1399_v3 = vld [vmem:[%s5384_s3 + $0x3f0] sm:$0xff] }
 0x272   :  { %v1400_v52 = vld [vmem:[%s5384_s3 + $0x3f8] sm:$0xff]  ;;  %v2049_v50 = vmul.f32 %v1728_v20, %v1377_v58  ;;  %v2050_v49 = vmul.f32 %v1728_v20, %v1378_v31  ;;  %v2071_v35 = vmul.f32 %v1783_v17, %v1399_v3  ;;  %v1788_v58 = vpop.permute.xlu1 %1787  ;;  %v1843_v31 = vpop.permute.xlu0 %1842 }
 0x273   :  { %2238 = vst [vmem:[%s5385_s4 + $0x320] sm:$0xff] %v2045_v40  ;;  %2239 = vst.msk [vmem:[%s5385_s4 + $0x328] sm:$0xff] %vm2138_vm1, %v2046_v26  ;;  %v2072_v39 = vmul.f32 %v1783_v17, %v1400_v52 }
 0x274   :  { %2260 = vst [vmem:[%s5385_s4 + $0x3d0] sm:$0xff] %v2067_v6  ;;  %2261 = vst.msk [vmem:[%s5385_s4 + $0x3d8] sm:$0xff] %vm2138_vm1, %v2068_v46 }
 0x27b   :  { %v1381_v23 = vld [vmem:[%s5384_s3 + $0x360] sm:$0xff]  ;;  %v1382_v38 = vld [vmem:[%s5384_s3 + $0x368] sm:$0xff]  ;;  %v1403_v36 = vld [vmem:[%s5384_s3 + $0x410] sm:$0xff] }
 0x27c   :  { %v1404_v34 = vld [vmem:[%s5384_s3 + $0x418] sm:$0xff]  ;;  %v2053_v7 = vmul.f32 %v1738_v15, %v1381_v23  ;;  %v2054_v24 = vmul.f32 %v1738_v15, %v1382_v38  ;;  %v2075_v51 = vmul.f32 %v1793_v28, %v1403_v36  ;;  %v1798_v23 = vpop.permute.xlu1 %1797  ;;  %v1853_v38 = vpop.permute.xlu0 %1852 }
 0x27d   :  { %2242 = vst [vmem:[%s5385_s4 + $0x340] sm:$0xff] %v2049_v50  ;;  %2243 = vst.msk [vmem:[%s5385_s4 + $0x348] sm:$0xff] %vm2138_vm1, %v2050_v49  ;;  %v2076_v12 = vmul.f32 %v1793_v28, %v1404_v34 }
 0x27e   :  { %2264 = vst [vmem:[%s5385_s4 + $0x3f0] sm:$0xff] %v2071_v35  ;;  %2265 = vst.msk [vmem:[%s5385_s4 + $0x3f8] sm:$0xff] %vm2138_vm1, %v2072_v39 }
 0x285   :  { %v1385_v19 = vld [vmem:[%s5384_s3 + $0x380] sm:$0xff]  ;;  %v1386_v62 = vld [vmem:[%s5384_s3 + $0x388] sm:$0xff]  ;;  %v1407_v1 = vld [vmem:[%s5384_s3 + $0x430] sm:$0xff] }
 0x286   :  { %v1408_v42 = vld [vmem:[%s5384_s3 + $0x438] sm:$0xff]  ;;  %v2057_v59 = vmul.f32 %v1748_v60, %v1385_v19  ;;  %v2058_v8 = vmul.f32 %v1748_v60, %v1386_v62  ;;  %v2079_v53 = vmul.f32 %v1803_v48, %v1407_v1  ;;  %v1808_v19 = vpop.permute.xlu1 %1807  ;;  %v1863_v62 = vpop.permute.xlu0 %1862 }
 0x287   :  { %2246 = vst [vmem:[%s5385_s4 + $0x360] sm:$0xff] %v2053_v7  ;;  %2247 = vst.msk [vmem:[%s5385_s4 + $0x368] sm:$0xff] %vm2138_vm1, %v2054_v24  ;;  %v2080_v29 = vmul.f32 %v1803_v48, %v1408_v42 }
 0x288   :  { %2268 = vst [vmem:[%s5385_s4 + $0x410] sm:$0xff] %v2075_v51  ;;  %2269 = vst.msk [vmem:[%s5385_s4 + $0x418] sm:$0xff] %vm2138_vm1, %v2076_v12 }
 0x28f   :  { %v1389_v43 = vld [vmem:[%s5384_s3 + $0x3a0] sm:$0xff]  ;;  %v1390_v55 = vld [vmem:[%s5384_s3 + $0x3a8] sm:$0xff]  ;;  %v1411_v45 = vld [vmem:[%s5384_s3 + $0x450] sm:$0xff] }
 0x290   :  { %v1412_v47 = vld [vmem:[%s5384_s3 + $0x458] sm:$0xff]  ;;  %v2061_v44 = vmul.f32 %v1758_v21, %v1389_v43  ;;  %v2062_v32 = vmul.f32 %v1758_v21, %v1390_v55  ;;  %v2083_v18 = vmul.f32 %v1813_v2, %v1411_v45  ;;  %v1818_v43 = vpop.permute.xlu1 %1817  ;;  %v1873_v55 = vpop.permute.xlu0 %1872 }
 0x291   :  { %2250 = vst [vmem:[%s5385_s4 + $0x380] sm:$0xff] %v2057_v59  ;;  %2251 = vst.msk [vmem:[%s5385_s4 + $0x388] sm:$0xff] %vm2138_vm1, %v2058_v8  ;;  %v2084_v9 = vmul.f32 %v1813_v2, %v1412_v47 }
 0x292   :  { %2272 = vst [vmem:[%s5385_s4 + $0x430] sm:$0xff] %v2079_v53  ;;  %2273 = vst.msk [vmem:[%s5385_s4 + $0x438] sm:$0xff] %vm2138_vm1, %v2080_v29 }
 0x299   :  { %v1393_v4 = vld [vmem:[%s5384_s3 + $0x3c0] sm:$0xff]  ;;  %v1394_v5 = vld [vmem:[%s5384_s3 + $0x3c8] sm:$0xff]  ;;  %v1415_v63 = vld [vmem:[%s5384_s3 + $0x470] sm:$0xff] }
 0x29a   :  { %v1416_v10 = vld [vmem:[%s5384_s3 + $0x478] sm:$0xff]  ;;  %v2065_v56 = vmul.f32 %v1768_v22, %v1393_v4  ;;  %v2066_v14 = vmul.f32 %v1768_v22, %v1394_v5  ;;  %v2087_v54 = vmul.f32 %v1823_v13, %v1415_v63  ;;  %v1828_v4 = vpop.permute.xlu1 %1827  ;;  %v1883_v5 = vpop.permute.xlu0 %1882 }
 0x29b   :  { %2254 = vst [vmem:[%s5385_s4 + $0x3a0] sm:$0xff] %v2061_v44  ;;  %2255 = vst.msk [vmem:[%s5385_s4 + $0x3a8] sm:$0xff] %vm2138_vm1, %v2062_v32  ;;  %v2088_v27 = vmul.f32 %v1823_v13, %v1416_v10 }
 0x29c   :  { %2276 = vst [vmem:[%s5385_s4 + $0x450] sm:$0xff] %v2083_v18  ;;  %2277 = vst.msk [vmem:[%s5385_s4 + $0x458] sm:$0xff] %vm2138_vm1, %v2084_v9 }
 0x2a3   :  { %v1397_v16 = vld [vmem:[%s5384_s3 + $0x3e0] sm:$0xff]  ;;  %v1398_v57 = vld [vmem:[%s5384_s3 + $0x3e8] sm:$0xff]  ;;  %v1419_v61 = vld [vmem:[%s5384_s3 + $0x490] sm:$0xff] }
 0x2a4   :  { %v1420_v30 = vld [vmem:[%s5384_s3 + $0x498] sm:$0xff]  ;;  %v2069_v0 = vmul.f32 %v1778_v25, %v1397_v16  ;;  %v2070_v37 = vmul.f32 %v1778_v25, %v1398_v57  ;;  %v2091_v33 = vmul.f32 %v1833_v11, %v1419_v61  ;;  %v1838_v16 = vpop.permute.xlu1 %1837  ;;  %v1893_v57 = vpop.permute.xlu0 %1892 }
 0x2a5   :  { %2258 = vst [vmem:[%s5385_s4 + $0x3c0] sm:$0xff] %v2065_v56  ;;  %2259 = vst.msk [vmem:[%s5385_s4 + $0x3c8] sm:$0xff] %vm2138_vm1, %v2066_v14  ;;  %v2092_v41 = vmul.f32 %v1833_v11, %v1420_v30 }
 0x2a6   :  { %2280 = vst [vmem:[%s5385_s4 + $0x470] sm:$0xff] %v2087_v54  ;;  %2281 = vst.msk [vmem:[%s5385_s4 + $0x478] sm:$0xff] %vm2138_vm1, %v2088_v27 }
 0x2ad   :  { %v1401_v40 = vld [vmem:[%s5384_s3 + $0x400] sm:$0xff]  ;;  %v1402_v26 = vld [vmem:[%s5384_s3 + $0x408] sm:$0xff]  ;;  %v1423_v6 = vld [vmem:[%s5384_s3 + $0x4b0] sm:$0xff] }
 0x2ae   :  { %v1424_v46 = vld [vmem:[%s5384_s3 + $0x4b8] sm:$0xff]  ;;  %v2073_v3 = vmul.f32 %v1788_v58, %v1401_v40  ;;  %v2074_v52 = vmul.f32 %v1788_v58, %v1402_v26  ;;  %v2095_v20 = vmul.f32 %v1843_v31, %v1423_v6  ;;  %v1848_v40 = vpop.permute.xlu1 %1847  ;;  %v1903_v26 = vpop.permute.xlu0 %1902 }
 0x2af   :  { %2262 = vst [vmem:[%s5385_s4 + $0x3e0] sm:$0xff] %v2069_v0  ;;  %2263 = vst.msk [vmem:[%s5385_s4 + $0x3e8] sm:$0xff] %vm2138_vm1, %v2070_v37  ;;  %v2096_v17 = vmul.f32 %v1843_v31, %v1424_v46 }
 0x2b0   :  { %2284 = vst [vmem:[%s5385_s4 + $0x490] sm:$0xff] %v2091_v33  ;;  %2285 = vst.msk [vmem:[%s5385_s4 + $0x498] sm:$0xff] %vm2138_vm1, %v2092_v41 }
 0x2b7   :  { %v1405_v50 = vld [vmem:[%s5384_s3 + $0x420] sm:$0xff]  ;;  %v1406_v49 = vld [vmem:[%s5384_s3 + $0x428] sm:$0xff]  ;;  %v1427_v35 = vld [vmem:[%s5384_s3 + $0x4d0] sm:$0xff] }
 0x2b8   :  { %v1428_v39 = vld [vmem:[%s5384_s3 + $0x4d8] sm:$0xff]  ;;  %v2077_v36 = vmul.f32 %v1798_v23, %v1405_v50  ;;  %v2078_v34 = vmul.f32 %v1798_v23, %v1406_v49  ;;  %v2099_v15 = vmul.f32 %v1853_v38, %v1427_v35  ;;  %v1858_v50 = vpop.permute.xlu1 %1857  ;;  %v1913_v49 = vpop.permute.xlu0 %1912 }
 0x2b9   :  { %2266 = vst [vmem:[%s5385_s4 + $0x400] sm:$0xff] %v2073_v3  ;;  %2267 = vst.msk [vmem:[%s5385_s4 + $0x408] sm:$0xff] %vm2138_vm1, %v2074_v52  ;;  %v2100_v28 = vmul.f32 %v1853_v38, %v1428_v39 }
 0x2ba   :  { %2288 = vst [vmem:[%s5385_s4 + $0x4b0] sm:$0xff] %v2095_v20  ;;  %2289 = vst.msk [vmem:[%s5385_s4 + $0x4b8] sm:$0xff] %vm2138_vm1, %v2096_v17 }
 0x2c1   :  { %v1409_v7 = vld [vmem:[%s5384_s3 + $0x440] sm:$0xff]  ;;  %v1410_v24 = vld [vmem:[%s5384_s3 + $0x448] sm:$0xff]  ;;  %v1431_v51 = vld [vmem:[%s5384_s3 + $0x4f0] sm:$0xff] }
 0x2c2   :  { %v1432_v12 = vld [vmem:[%s5384_s3 + $0x4f8] sm:$0xff]  ;;  %v2081_v1 = vmul.f32 %v1808_v19, %v1409_v7  ;;  %v2082_v42 = vmul.f32 %v1808_v19, %v1410_v24  ;;  %v2103_v60 = vmul.f32 %v1863_v62, %v1431_v51  ;;  %v1868_v7 = vpop.permute.xlu1 %1867  ;;  %v1923_v24 = vpop.permute.xlu0 %1922 }
 0x2c3   :  { %2270 = vst [vmem:[%s5385_s4 + $0x420] sm:$0xff] %v2077_v36  ;;  %2271 = vst.msk [vmem:[%s5385_s4 + $0x428] sm:$0xff] %vm2138_vm1, %v2078_v34  ;;  %v2104_v48 = vmul.f32 %v1863_v62, %v1432_v12 }
 0x2c4   :  { %2292 = vst [vmem:[%s5385_s4 + $0x4d0] sm:$0xff] %v2099_v15  ;;  %2293 = vst.msk [vmem:[%s5385_s4 + $0x4d8] sm:$0xff] %vm2138_vm1, %v2100_v28 }
 0x2cb   :  { %v1413_v59 = vld [vmem:[%s5384_s3 + $0x460] sm:$0xff]  ;;  %v1414_v8 = vld [vmem:[%s5384_s3 + $0x468] sm:$0xff]  ;;  %v1435_v53 = vld [vmem:[%s5384_s3 + $0x510] sm:$0xff] }
 0x2cc   :  { %v1436_v29 = vld [vmem:[%s5384_s3 + $0x518] sm:$0xff]  ;;  %v2085_v45 = vmul.f32 %v1818_v43, %v1413_v59  ;;  %v2086_v47 = vmul.f32 %v1818_v43, %v1414_v8  ;;  %v2107_v21 = vmul.f32 %v1873_v55, %v1435_v53  ;;  %v1878_v59 = vpop.permute.xlu1 %1877  ;;  %v1933_v8 = vpop.permute.xlu0 %1932 }
 0x2cd   :  { %2274 = vst [vmem:[%s5385_s4 + $0x440] sm:$0xff] %v2081_v1  ;;  %2275 = vst.msk [vmem:[%s5385_s4 + $0x448] sm:$0xff] %vm2138_vm1, %v2082_v42  ;;  %v2108_v2 = vmul.f32 %v1873_v55, %v1436_v29 }
 0x2ce   :  { %2296 = vst [vmem:[%s5385_s4 + $0x4f0] sm:$0xff] %v2103_v60  ;;  %2297 = vst.msk [vmem:[%s5385_s4 + $0x4f8] sm:$0xff] %vm2138_vm1, %v2104_v48 }
 0x2d5   :  { %v1417_v44 = vld [vmem:[%s5384_s3 + $0x480] sm:$0xff]  ;;  %v1418_v32 = vld [vmem:[%s5384_s3 + $0x488] sm:$0xff]  ;;  %v1439_v18 = vld [vmem:[%s5384_s3 + $0x530] sm:$0xff] }
 0x2d6   :  { %v1440_v9 = vld [vmem:[%s5384_s3 + $0x538] sm:$0xff]  ;;  %v2089_v63 = vmul.f32 %v1828_v4, %v1417_v44  ;;  %v2090_v10 = vmul.f32 %v1828_v4, %v1418_v32  ;;  %v2111_v22 = vmul.f32 %v1883_v5, %v1439_v18  ;;  %v1888_v44 = vpop.permute.xlu1 %1887  ;;  %v1943_v32 = vpop.permute.xlu0 %1942 }
 0x2d7   :  { %2278 = vst [vmem:[%s5385_s4 + $0x460] sm:$0xff] %v2085_v45  ;;  %2279 = vst.msk [vmem:[%s5385_s4 + $0x468] sm:$0xff] %vm2138_vm1, %v2086_v47  ;;  %v2112_v13 = vmul.f32 %v1883_v5, %v1440_v9 }
 0x2d8   :  { %2300 = vst [vmem:[%s5385_s4 + $0x510] sm:$0xff] %v2107_v21  ;;  %2301 = vst.msk [vmem:[%s5385_s4 + $0x518] sm:$0xff] %vm2138_vm1, %v2108_v2 }
 0x2df   :  { %v1421_v56 = vld [vmem:[%s5384_s3 + $0x4a0] sm:$0xff]  ;;  %v1422_v14 = vld [vmem:[%s5384_s3 + $0x4a8] sm:$0xff]  ;;  %v1443_v54 = vld [vmem:[%s5384_s3 + $0x550] sm:$0xff] }
 0x2e0   :  { %v1444_v27 = vld [vmem:[%s5384_s3 + $0x558] sm:$0xff]  ;;  %v2093_v61 = vmul.f32 %v1838_v16, %v1421_v56  ;;  %v2094_v30 = vmul.f32 %v1838_v16, %v1422_v14  ;;  %v2115_v25 = vmul.f32 %v1893_v57, %v1443_v54 }
 0x2e1   :  { %2282 = vst [vmem:[%s5385_s4 + $0x480] sm:$0xff] %v2089_v63  ;;  %2283 = vst.msk [vmem:[%s5385_s4 + $0x488] sm:$0xff] %vm2138_vm1, %v2090_v10  ;;  %v2116_v11 = vmul.f32 %v1893_v57, %v1444_v27 }
 0x2e2   :  { %2304 = vst [vmem:[%s5385_s4 + $0x530] sm:$0xff] %v2111_v22  ;;  %2305 = vst.msk [vmem:[%s5385_s4 + $0x538] sm:$0xff] %vm2138_vm1, %v2112_v13  ;;  %v1898_v22 = vpop.permute.xlu1 %1897 }
 0x2e6   :  { %v1908_v27 = vpop.permute.xlu1 %1907 }
 0x2e9   :  { %v1425_v0 = vld [vmem:[%s5384_s3 + $0x4c0] sm:$0xff]  ;;  %v1426_v37 = vld [vmem:[%s5384_s3 + $0x4c8] sm:$0xff]  ;;  %v1447_v33 = vld [vmem:[%s5384_s3 + $0x570] sm:$0xff] }
 0x2ea   :  { %v1448_v41 = vld [vmem:[%s5384_s3 + $0x578] sm:$0xff]  ;;  %v2097_v6 = vmul.f32 %v1848_v40, %v1425_v0  ;;  %v2098_v46 = vmul.f32 %v1848_v40, %v1426_v37  ;;  %v2119_v58 = vmul.f32 %v1903_v26, %v1447_v33 }
 0x2eb   :  { %2286 = vst [vmem:[%s5385_s4 + $0x4a0] sm:$0xff] %v2093_v61  ;;  %2287 = vst.msk [vmem:[%s5385_s4 + $0x4a8] sm:$0xff] %vm2138_vm1, %v2094_v30  ;;  %v2120_v31 = vmul.f32 %v1903_v26, %v1448_v41 }
 0x2ec   :  { %2308 = vst [vmem:[%s5385_s4 + $0x550] sm:$0xff] %v2115_v25  ;;  %2309 = vst.msk [vmem:[%s5385_s4 + $0x558] sm:$0xff] %vm2138_vm1, %v2116_v11  ;;  %v1918_v25 = vpop.permute.xlu1 %1917 }
 0x2f0   :  { %v1928_v41 = vpop.permute.xlu1 %1927 }
 0x2f3   :  { %v1429_v3 = vld [vmem:[%s5384_s3 + $0x4e0] sm:$0xff]  ;;  %v1430_v52 = vld [vmem:[%s5384_s3 + $0x4e8] sm:$0xff]  ;;  %v1451_v20 = vld [vmem:[%s5384_s3 + $0x590] sm:$0xff] }
 0x2f4   :  { %v1452_v17 = vld [vmem:[%s5384_s3 + $0x598] sm:$0xff]  ;;  %v2101_v35 = vmul.f32 %v1858_v50, %v1429_v3  ;;  %v2102_v39 = vmul.f32 %v1858_v50, %v1430_v52  ;;  %v2123_v23 = vmul.f32 %v1913_v49, %v1451_v20 }
 0x2f5   :  { %2290 = vst [vmem:[%s5385_s4 + $0x4c0] sm:$0xff] %v2097_v6  ;;  %2291 = vst.msk [vmem:[%s5385_s4 + $0x4c8] sm:$0xff] %vm2138_vm1, %v2098_v46  ;;  %v2124_v38 = vmul.f32 %v1913_v49, %v1452_v17 }
 0x2f6   :  { %2312 = vst [vmem:[%s5385_s4 + $0x570] sm:$0xff] %v2119_v58  ;;  %2313 = vst.msk [vmem:[%s5385_s4 + $0x578] sm:$0xff] %vm2138_vm1, %v2120_v31  ;;  %v1938_v58 = vpop.permute.xlu1 %1937 }
 0x2fd   :  { %v1433_v36 = vld [vmem:[%s5384_s3 + $0x500] sm:$0xff]  ;;  %v1434_v34 = vld [vmem:[%s5384_s3 + $0x508] sm:$0xff]  ;;  %v1455_v15 = vld [vmem:[%s5384_s3 + $0x5b0] sm:$0xff] }
 0x2fe   :  { %v1456_v28 = vld [vmem:[%s5384_s3 + $0x5b8] sm:$0xff]  ;;  %v2105_v51 = vmul.f32 %v1868_v7, %v1433_v36  ;;  %v2106_v12 = vmul.f32 %v1868_v7, %v1434_v34  ;;  %v2127_v19 = vmul.f32 %v1923_v24, %v1455_v15 }
 0x2ff   :  { %2294 = vst [vmem:[%s5385_s4 + $0x4e0] sm:$0xff] %v2101_v35  ;;  %2295 = vst.msk [vmem:[%s5385_s4 + $0x4e8] sm:$0xff] %vm2138_vm1, %v2102_v39  ;;  %v2128_v62 = vmul.f32 %v1923_v24, %v1456_v28 }
 0x300   :  { %2316 = vst [vmem:[%s5385_s4 + $0x590] sm:$0xff] %v2123_v23  ;;  %2317 = vst.msk [vmem:[%s5385_s4 + $0x598] sm:$0xff] %vm2138_vm1, %v2124_v38 }
 0x307   :  { %v1437_v1 = vld [vmem:[%s5384_s3 + $0x520] sm:$0xff]  ;;  %v1438_v42 = vld [vmem:[%s5384_s3 + $0x528] sm:$0xff]  ;;  %v1459_v60 = vld [vmem:[%s5384_s3 + $0x5d0] sm:$0xff] }
 0x308   :  { %v1460_v48 = vld [vmem:[%s5384_s3 + $0x5d8] sm:$0xff]  ;;  %v2109_v53 = vmul.f32 %v1878_v59, %v1437_v1  ;;  %v2110_v29 = vmul.f32 %v1878_v59, %v1438_v42  ;;  %v2131_v43 = vmul.f32 %v1933_v8, %v1459_v60 }
 0x309   :  { %2298 = vst [vmem:[%s5385_s4 + $0x500] sm:$0xff] %v2105_v51  ;;  %2299 = vst.msk [vmem:[%s5385_s4 + $0x508] sm:$0xff] %vm2138_vm1, %v2106_v12  ;;  %v2132_v55 = vmul.f32 %v1933_v8, %v1460_v48 }
 0x30a   :  { %2320 = vst [vmem:[%s5385_s4 + $0x5b0] sm:$0xff] %v2127_v19  ;;  %2321 = vst.msk [vmem:[%s5385_s4 + $0x5b8] sm:$0xff] %vm2138_vm1, %v2128_v62 }
 0x311   :  { %v1441_v45 = vld [vmem:[%s5384_s3 + $0x540] sm:$0xff]  ;;  %v1442_v47 = vld [vmem:[%s5384_s3 + $0x548] sm:$0xff]  ;;  %v1463_v21 = vld [vmem:[%s5384_s3 + $0x5f0] sm:$0xff] }
 0x312   :  { %v1464_v2 = vld [vmem:[%s5384_s3 + $0x5f8] sm:$0xff]  ;;  %v2113_v18 = vmul.f32 %v1888_v44, %v1441_v45  ;;  %v2114_v9 = vmul.f32 %v1888_v44, %v1442_v47  ;;  %v2135_v4 = vmul.f32 %v1943_v32, %v1463_v21 }
 0x313   :  { %2302 = vst [vmem:[%s5385_s4 + $0x520] sm:$0xff] %v2109_v53  ;;  %2303 = vst.msk [vmem:[%s5385_s4 + $0x528] sm:$0xff] %vm2138_vm1, %v2110_v29  ;;  %v2136_v5 = vmul.f32 %v1943_v32, %v1464_v2 }
 0x314   :  { %2324 = vst [vmem:[%s5385_s4 + $0x5d0] sm:$0xff] %v2131_v43  ;;  %2325 = vst.msk [vmem:[%s5385_s4 + $0x5d8] sm:$0xff] %vm2138_vm1, %v2132_v55 }
 0x31b   :  { %v1445_v63 = vld [vmem:[%s5384_s3 + $0x560] sm:$0xff]  ;;  %v1446_v10 = vld [vmem:[%s5384_s3 + $0x568] sm:$0xff] }
 0x31c   :  { %2306 = vst [vmem:[%s5385_s4 + $0x540] sm:$0xff] %v2113_v18  ;;  %2307 = vst.msk [vmem:[%s5385_s4 + $0x548] sm:$0xff] %vm2138_vm1, %v2114_v9  ;;  %v2117_v13 = vmul.f32 %v1898_v22, %v1445_v63  ;;  %v2118_v56 = vmul.f32 %v1898_v22, %v1446_v10 }
 0x31d   :  { %2328 = vst [vmem:[%s5385_s4 + $0x5f0] sm:$0xff] %v2135_v4  ;;  %2329 = vst.msk [vmem:[%s5385_s4 + $0x5f8] sm:$0xff] %vm2138_vm1, %v2136_v5 }
 0x324   :  { %v1449_v14 = vld [vmem:[%s5384_s3 + $0x580] sm:$0xff]  ;;  %v1450_v54 = vld [vmem:[%s5384_s3 + $0x588] sm:$0xff] }
 0x325   :  { %2310 = vst [vmem:[%s5385_s4 + $0x560] sm:$0xff] %v2117_v13  ;;  %2311 = vst.msk [vmem:[%s5385_s4 + $0x568] sm:$0xff] %vm2138_vm1, %v2118_v56  ;;  %v2121_v16 = vmul.f32 %v1908_v27, %v1449_v14  ;;  %v2122_v57 = vmul.f32 %v1908_v27, %v1450_v54 }
 0x32c   :  { %v1453_v61 = vld [vmem:[%s5384_s3 + $0x5a0] sm:$0xff]  ;;  %v1454_v30 = vld [vmem:[%s5384_s3 + $0x5a8] sm:$0xff] }
 0x32d   :  { %2314 = vst [vmem:[%s5385_s4 + $0x580] sm:$0xff] %v2121_v16  ;;  %2315 = vst.msk [vmem:[%s5385_s4 + $0x588] sm:$0xff] %vm2138_vm1, %v2122_v57  ;;  %v2125_v11 = vmul.f32 %v1918_v25, %v1453_v61  ;;  %v2126_v0 = vmul.f32 %v1918_v25, %v1454_v30 }
 0x334   :  { %v1457_v37 = vld [vmem:[%s5384_s3 + $0x5c0] sm:$0xff]  ;;  %v1458_v33 = vld [vmem:[%s5384_s3 + $0x5c8] sm:$0xff] }
 0x335   :  { %2318 = vst [vmem:[%s5385_s4 + $0x5a0] sm:$0xff] %v2125_v11  ;;  %2319 = vst.msk [vmem:[%s5385_s4 + $0x5a8] sm:$0xff] %vm2138_vm1, %v2126_v0  ;;  %v2129_v40 = vmul.f32 %v1928_v41, %v1457_v37  ;;  %v2130_v26 = vmul.f32 %v1928_v41, %v1458_v33 }
 0x33c   :  { %v1461_v6 = vld [vmem:[%s5384_s3 + $0x5e0] sm:$0xff]  ;;  %v1462_v46 = vld [vmem:[%s5384_s3 + $0x5e8] sm:$0xff] }
 0x33d   :  { %2322 = vst [vmem:[%s5385_s4 + $0x5c0] sm:$0xff] %v2129_v40  ;;  %2323 = vst.msk [vmem:[%s5385_s4 + $0x5c8] sm:$0xff] %vm2138_vm1, %v2130_v26  ;;  %v2133_v31 = vmul.f32 %v1938_v58, %v1461_v6  ;;  %v2134_v3 = vmul.f32 %v1938_v58, %v1462_v46 }
 0x33f   :  { %2326 = vst [vmem:[%s5385_s4 + $0x5e0] sm:$0xff] %v2133_v31  ;;  %2327 = vst.msk [vmem:[%s5385_s4 + $0x5e8] sm:$0xff] %vm2138_vm1, %v2134_v3 }

</bundles_post_ra>
